<compile_context>
chip_gen: v7x
topology: tpu7x:2x2x1
jax: 0.10.0
libtpu: 0.0.40
codegen_flags: <defaults>
</compile_context>

<pallas_src>
import jax
import jax.numpy as jnp
from jax import lax
from jax.experimental import pallas as pl
from jax.experimental.pallas import tpu as pltpu

BN_EPS = 1e-5


# ------------------------------ small helpers ------------------------------ #

def _row_tile(m, target):
    """Largest multiple-of-8 divisor of m that is <= target (row-tile size)."""
    t = min(target, m)
    t -= t % 8
    while t >= 8:
        if m % t == 0:
            return t
        t -= 8
    return m


# ----------------------------- Pallas kernels ------------------------------ #

def _conv1x1_kernel(x_ref, w_ref, b_ref, o_ref):
    # x: [TM, Cin] f32   w: [Cin, Cout] bf16   b: [1, Cout] f32   o: [TM, Cout] f32
    xb = x_ref[...].astype(jnp.bfloat16)
    o_ref[...] = (
        jnp.dot(xb, w_ref[...], preferred_element_type=jnp.float32) + b_ref[...]
    )


def _make_conv3x3_stats_kernel(h, w, c):
    hw = h * w

    def kernel(x_ref, w_ref, conv_ref, psum_ref, psq_ref, xp_ref):
        # x_ref:    (1, h, w, c)   f32 input image
        # w_ref:    (9, c, c)      bf16 conv taps, index = ky*3+kx, [cin, cout]
        # conv_ref: (hw, c)        f32 conv output rows of this image
        # psum/psq: (1, 1, c)      f32 per-image sum / sum-of-squares of conv
        # xp_ref:   (h+2, w+2, c)  f32 VMEM scratch = zero-padded halo tile
        xp_ref[...] = jnp.zeros_like(xp_ref)
        xp_ref[1:h + 1, 1:w + 1, :] = x_ref[0]

        acc = jnp.zeros((hw, c), jnp.float32)
        for ky in range(3):
            for kx in range(3):
                win = xp_ref[ky:ky + h, kx:kx + w, :].reshape(hw, c)
                acc = acc + jnp.dot(
                    win.astype(jnp.bfloat16),
                    w_ref[ky * 3 + kx],
                    preferred_element_type=jnp.float32,
                )

        conv_ref[...] = acc
        psum_ref[0] = jnp.sum(acc, axis=0, keepdims=True)
        psq_ref[0] = jnp.sum(acc * acc, axis=0, keepdims=True)

    return kernel


def _bn_relu_kernel(conv_ref, scale_ref, shift_ref, o_ref):
    y = conv_ref[...] * scale_ref[...] + shift_ref[...]
    o_ref[...] = jnp.maximum(y, 0.0)


def _bn_relu_add_kernel(conv_ref, scale_ref, shift_ref, res_ref, o_ref):
    y = conv_ref[...] * scale_ref[...] + shift_ref[...]
    o_ref[...] = res_ref[...] + jnp.maximum(y, 0.0)


# ------------------------------ JAX wrappers ------------------------------- #

def conv1x1(x_nhwc, w, b):
    """y = conv1x1(x) + b, tiled over rows.  w: [Cin, Cout] bf16, b: [Cout] f32."""
    n, h, wd, cin = x_nhwc.shape
    cout = w.shape[1]
    m = n * h * wd
    tm = _row_tile(m, min(1024, max(8, m // 2)))
    xm = x_nhwc.reshape(m, cin)
    out = pl.pallas_call(
        _conv1x1_kernel,
        out_shape=jax.ShapeDtypeStruct((m, cout), jnp.float32),
        grid=(m // tm,),
        in_specs=[
            pl.BlockSpec((tm, cin), lambda i: (i, 0)),
            pl.BlockSpec((cin, cout), lambda i: (0, 0)),
            pl.BlockSpec((1, cout), lambda i: (0, 0)),
        ],
        out_specs=pl.BlockSpec((tm, cout), lambda i: (i, 0)),
        compiler_params=pltpu.CompilerParams(dimension_semantics=("parallel",)),
    )(xm, w, b.reshape(1, cout))
    return out.reshape(n, h, wd, cout)


def conv3x3_stats(x_nhwc, w9):
    """3x3 'same' conv (no bias) + per-image sum / sum-of-squares for BN."""
    n, h, w, c = x_nhwc.shape
    hw = h * w
    kernel = _make_conv3x3_stats_kernel(h, w, c)
    conv, psum, psq = pl.pallas_call(
        kernel,
        out_shape=(
            jax.ShapeDtypeStruct((n * hw, c), jnp.float32),
            jax.ShapeDtypeStruct((n, 1, c), jnp.float32),
            jax.ShapeDtypeStruct((n, 1, c), jnp.float32),
        ),
        grid=(n,),
        in_specs=[
            pl.BlockSpec((1, h, w, c), lambda i: (i, 0, 0, 0)),
            pl.BlockSpec((9, c, c), lambda i: (0, 0, 0)),
        ],
        out_specs=(
            pl.BlockSpec((hw, c), lambda i: (i, 0)),
            pl.BlockSpec((1, 1, c), lambda i: (i, 0, 0)),
            pl.BlockSpec((1, 1, c), lambda i: (i, 0, 0)),
        ),
        scratch_shapes=[pltpu.VMEM((h + 2, w + 2, c), jnp.float32)],
        compiler_params=pltpu.CompilerParams(dimension_semantics=("parallel",)),
    )(x_nhwc, w9)
    return conv, psum, psq


def _bn_scale_shift(psum, psq, gamma, beta, m_total):
    # Tiny [C]-sized finalize (plain JAX glue): global batch mean / biased var.
    s = jnp.sum(psum, axis=(0, 1))
    sq = jnp.sum(psq, axis=(0, 1))
    mean = s / m_total
    var = jnp.maximum(sq / m_total - mean * mean, 0.0)
    inv = lax.rsqrt(var + BN_EPS)
    scale = gamma * inv
    shift = beta - mean * scale
    return scale, shift


def bn_relu_apply(conv_m, scale, shift, residual_m=None):
    """out = [residual +] relu(conv*scale + shift), row-tiled and pipelined."""
    m, c = conv_m.shape
    tm = _row_tile(m, min(1024, max(8, m // 2)))
    row_spec = pl.BlockSpec((tm, c), lambda i: (i, 0))
    vec_spec = pl.BlockSpec((1, c), lambda i: (0, 0))
    args = [conv_m, scale.reshape(1, c), shift.reshape(1, c)]
    in_specs = [row_spec, vec_spec, vec_spec]
    kernel = _bn_relu_kernel
    if residual_m is not None:
        args.append(residual_m)
        in_specs.append(row_spec)
        kernel = _bn_relu_add_kernel
    return pl.pallas_call(
        kernel,
        out_shape=jax.ShapeDtypeStruct((m, c), jnp.float32),
        grid=(m // tm,),
        in_specs=in_specs,
        out_specs=row_spec,
        compiler_params=pltpu.CompilerParams(dimension_semantics=("parallel",)),
    )(*args)


def conv_bn_relu(x_nhwc, w9, gamma, beta, residual=None):
    """relu(batchnorm_train(conv3x3(x))) [+ residual], all heavy work in Pallas."""
    n, h, w, c = x_nhwc.shape
    m = n * h * w
    conv_m, psum, psq = conv3x3_stats(x_nhwc, w9)
    scale, shift = _bn_scale_shift(psum, psq, gamma, beta, float(m))
    res_m = None if residual is None else residual.reshape(m, c)
    out = bn_relu_apply(conv_m, scale, shift, res_m)
    return out.reshape(n, h, w, c)


def recurrent_block(x, params, out_residual=None):
    """Recurrent_block: conv/bn parameters are SHARED between both applications.
    If `out_residual` is given it is added (fused) into the block's output."""
    w9, gamma, beta = params
    # x1 = relu(bn(conv(x)));  s = x + x1   (the add is fused into BN-apply)
    s = conv_bn_relu(x, w9, gamma, beta, residual=x)
    # out = relu(bn(conv(x + x1)))  [+ out_residual, fused]
    return conv_bn_relu(s, w9, gamma, beta, residual=out_residual)


def rrcnn_block(x_nhwc, params):
    y = conv1x1(x_nhwc, params["w1x1"], params["b1x1"])
    r1 = recurrent_block(y, params["rec1"])
    # Final "y + r" residual is fused into the very last BN-apply kernel.
    return recurrent_block(r1, params["rec2"], out_residual=y)


# ------------------------- Deterministic parameters ------------------------ #

def init_params(key, ch_in, ch_out):
    k1, k2, k3, k4 = jax.random.split(key, 4)

    def rec_params(k):
        # conv3x3 taps stored as [ky*3+kx, cin, cout]; equivalent PyTorch weight
        # satisfies w_pt[cout, cin, ky, kx] == w9[ky*3+kx, cin, cout].
        w9 = 0.1 * jax.random.normal(k, (3, 3, ch_out, ch_out), jnp.float32)
        w9 = w9.reshape(9, ch_out, ch_out).astype(jnp.bfloat16)
        # NOTE: the PyTorch conv bias is intentionally omitted — BatchNorm2d in
        # training mode subtracts the batch mean, so the bias cancels exactly.
        gamma = jnp.ones((ch_out,), jnp.float32)   # BatchNorm2d default init
        beta = jnp.zeros((ch_out,), jnp.float32)
        return (w9, gamma, beta)

    return {
        "w1x1": (0.1 * jax.random.normal(k1, (ch_in, ch_out), jnp.float32)
                 ).astype(jnp.bfloat16),
        "b1x1": 0.1 * jax.random.normal(k2, (ch_out,), jnp.float32),
        "rec1": rec_params(k3),
        "rec2": rec_params(k4),
    }


# ------------------------- Pure-JAX reference (check) ----------------------- #

def _ref_conv_bn_relu(x, w9, gamma, beta):
    c = x.shape[-1]
    w_hwio = w9.astype(jnp.float32).reshape(3, 3, c, c)
    conv = lax.conv_general_dilated(
        x, w_hwio, window_strides=(1, 1), padding=((1, 1), (1, 1)),
        dimension_numbers=("NHWC", "HWIO", "NHWC"))
    mean = conv.mean(axis=(0, 1, 2))
    var = ((conv - mean) ** 2).mean(axis=(0, 1, 2))
    return jnp.maximum((conv - mean) * lax.rsqrt(var + BN_EPS) * gamma + beta, 0.0)


def _ref_rrcnn(x_nhwc, params):
    y = jnp.einsum("nhwc,cd->nhwd", x_nhwc,
                   params["w1x1"].astype(jnp.float32)) + params["b1x1"]

    def rec(z, p):
        w9, gamma, beta = p
        z1 = _ref_conv_bn_relu(z, w9, gamma, beta)
        return _ref_conv_bn_relu(z + z1, w9, gamma, beta)

    return y + rec(rec(y, params["rec1"]), params["rec2"])


# ----------------------------------- Main ----------------------------------- #

if __name__ == "__main__":
    key = jax.random.PRNGKey(0)
    N, CH_IN, CH_OUT, H, W = 2, 4, 8, 16, 16

    kx, kp = jax.random.split(key)
    x_nchw = jax.random.normal(kx, (N, CH_IN, H, W), jnp.float32)  # PyTorch layout
    x_nhwc = jnp.transpose(x_nchw, (0, 2, 3, 1))                   # kernel layout

    params = init_params(kp, CH_IN, CH_OUT)

    out_nhwc = jax.jit(rrcnn_block)(x_nhwc, params)
    out_nchw = jnp.transpose(out_nhwc, (0, 3, 1, 2))               # back to NCHW
    jax.block_until_ready(out_nchw)

    assert out_nchw.shape == (N, CH_OUT, H, W)
    assert bool(jnp.all(jnp.isfinite(out_nchw)))

    # Cross-check against a pure-JAX reference of the same math; the tolerance
    # covers the bf16 MXU inputs (accumulation and BN stay in f32).
    ref = _ref_rrcnn(x_nhwc, params)
    err = float(jnp.max(jnp.abs(out_nhwc - ref)))
    assert err < 2e-1, err

    print("KERNEL_OK")
</pallas_src>

<mosaic_0001>
module attributes {stable_mosaic.version = 11 : i64} {
  func.func @_conv1x1_kernel(%arg0: i32, %arg1: memref<256x4xf32, #tpu.memory_space<vmem>>, %arg2: memref<4x8xbf16, #tpu.memory_space<vmem>>, %arg3: memref<1x8xf32, #tpu.memory_space<vmem>>, %arg4: memref<256x8xf32, #tpu.memory_space<vmem>>) attributes {dimension_semantics = [#tpu.dimension_semantics<parallel>], iteration_bounds = array<i64: 2>, scalar_prefetch = 0 : i64, scratch_operands = 0 : i64, tpu.core_type = #tpu.core_type<tc>, window_params = [{transform_indices = @transform_0, window_bounds = array<i64: 256, 4>}, {pipeline_mode = #tpu.pipeline_mode<synchronous>, transform_indices = @transform_1, window_bounds = array<i64: 4, 8>}, {pipeline_mode = #tpu.pipeline_mode<synchronous>, transform_indices = @transform_2, window_bounds = array<i64: 1, 8>}, {transform_indices = @transform_3, window_bounds = array<i64: 256, 8>}]} {
    %c0 = arith.constant 0 : index
    %c0_0 = arith.constant 0 : index
    %0 = vector.load %arg1[%c0, %c0_0] : memref<256x4xf32, #tpu.memory_space<vmem>>, vector<256x4xf32>
    %1 = arith.truncf %0 : vector<256x4xf32> to vector<256x4xbf16>
    %c0_1 = arith.constant 0 : index
    %c0_2 = arith.constant 0 : index
    %2 = vector.load %arg2[%c0_1, %c0_2] : memref<4x8xbf16, #tpu.memory_space<vmem>>, vector<4x8xbf16>
    %cst = arith.constant dense<0.000000e+00> : vector<256x8xf32>
    %3 = tpu.matmul %1, %2, %cst {dimension_numbers = #tpu.dot_dimension_numbers<[1], [0], [0], [1], [0, 0, 1, 1], [], []>} : vector<256x4xbf16>, vector<4x8xbf16>, vector<256x8xf32> -> vector<256x8xf32>
    %c0_3 = arith.constant 0 : index
    %c0_4 = arith.constant 0 : index
    %4 = vector.load %arg3[%c0_3, %c0_4] : memref<1x8xf32, #tpu.memory_space<vmem>>, vector<1x8xf32>
    %5 = vector.broadcast %4 : vector<1x8xf32> to vector<256x8xf32>
    %6 = arith.addf %3, %5 : vector<256x8xf32>
    %c0_5 = arith.constant 0 : index
    %c0_6 = arith.constant 0 : index
    %7 = vector.load %arg4[%c0_5, %c0_6] : memref<256x8xf32, #tpu.memory_space<vmem>>, vector<256x8xf32>
    tpu.vector_store %arg4[%c0_5, %c0_6], %6 {strides = array<i32>} : memref<256x8xf32, #tpu.memory_space<vmem>>, vector<256x8xf32>,
    return
  }
  func.func @transform_0(%arg0: i32) -> (i32, i32) {
    %c0_i32 = arith.constant 0 : i32
    %c0_i32_0 = arith.constant 0 : i32
    return %arg0, %c0_i32 : i32, i32
  }
  func.func @transform_1(%arg0: i32) -> (i32, i32) {
    %c0_i32 = arith.constant 0 : i32
    %c0_i32_0 = arith.constant 0 : i32
    %c0_i32_1 = arith.constant 0 : i32
    return %c0_i32, %c0_i32_0 : i32, i32
  }
  func.func @transform_2(%arg0: i32) -> (i32, i32) {
    %c0_i32 = arith.constant 0 : i32
    %c0_i32_0 = arith.constant 0 : i32
    %c0_i32_1 = arith.constant 0 : i32
    return %c0_i32, %c0_i32_0 : i32, i32
  }
  func.func @transform_3(%arg0: i32) -> (i32, i32) {
    %c0_i32 = arith.constant 0 : i32
    %c0_i32_0 = arith.constant 0 : i32
    return %arg0, %c0_i32 : i32, i32
  }
}

module attributes {stable_mosaic.version = 11 : i64} {
  func.func @kernel(%arg0: i32, %arg1: memref<1x16x16x8xf32, #tpu.memory_space<vmem>>, %arg2: memref<9x8x8xbf16, #tpu.memory_space<vmem>>, %arg3: memref<256x8xf32, #tpu.memory_space<vmem>>, %arg4: memref<1x1x8xf32, #tpu.memory_space<vmem>>, %arg5: memref<1x1x8xf32, #tpu.memory_space<vmem>>, %arg6: memref<18x18x8xf32, #tpu.memory_space<vmem>>) attributes {dimension_semantics = [#tpu.dimension_semantics<parallel>], iteration_bounds = array<i64: 2>, scalar_prefetch = 0 : i64, scratch_operands = 1 : i64, tpu.core_type = #tpu.core_type<tc>, window_params = [{transform_indices = @transform_0, window_bounds = array<i64: 1, 16, 16, 8>}, {pipeline_mode = #tpu.pipeline_mode<synchronous>, transform_indices = @transform_1, window_bounds = array<i64: 9, 8, 8>}, {transform_indices = @transform_2, window_bounds = array<i64: 256, 8>}, {transform_indices = @transform_3, window_bounds = array<i64: 1, 1, 8>}, {transform_indices = @transform_4, window_bounds = array<i64: 1, 1, 8>}]} {
    %cst = arith.constant 0.000000e+00 : f32
    %0 = vector.broadcast %cst : f32 to vector<18x18x8xf32>
    %c0 = arith.constant 0 : index
    %c0_0 = arith.constant 0 : index
    %c0_1 = arith.constant 0 : index
    %1 = vector.load %arg6[%c0, %c0_0, %c0_1] : memref<18x18x8xf32, #tpu.memory_space<vmem>>, vector<18x18x8xf32>
    tpu.vector_store %arg6[%c0, %c0_0, %c0_1], %0 {strides = array<i32>} : memref<18x18x8xf32, #tpu.memory_space<vmem>>, vector<18x18x8xf32>,
    %c0_2 = arith.constant 0 : index
    %c0_3 = arith.constant 0 : index
    %c0_4 = arith.constant 0 : index
    %c0_5 = arith.constant 0 : index
    %2 = vector.load %arg1[%c0_2, %c0_3, %c0_4, %c0_5] : memref<1x16x16x8xf32, #tpu.memory_space<vmem>>, vector<1x16x16x8xf32>
    %3 = vector.shape_cast %2 : vector<1x16x16x8xf32> to vector<16x16x8xf32>
    %c1 = arith.constant 1 : index
    %c1_6 = arith.constant 1 : index
    %c0_7 = arith.constant 0 : index
    %4 = vector.load %arg6[%c1, %c1_6, %c0_7] : memref<18x18x8xf32, #tpu.memory_space<vmem>>, vector<16x16x8xf32>
    tpu.vector_store %arg6[%c1, %c1_6, %c0_7], %3 {strides = array<i32>} : memref<18x18x8xf32, #tpu.memory_space<vmem>>, vector<16x16x8xf32>,
    %cst_8 = arith.constant 0.000000e+00 : f32
    %5 = vector.broadcast %cst_8 : f32 to vector<256x8xf32>
    %c0_9 = arith.constant 0 : index
    %c0_10 = arith.constant 0 : index
    %c0_11 = arith.constant 0 : index
    %6 = vector.load %arg6[%c0_9, %c0_10, %c0_11] : memref<18x18x8xf32, #tpu.memory_space<vmem>>, vector<16x16x8xf32>
    %7 = vector.shape_cast %6 : vector<16x16x8xf32> to vector<256x8xf32>
    %8 = arith.truncf %7 : vector<256x8xf32> to vector<256x8xbf16>
    %c0_12 = arith.constant 0 : index
    %c0_13 = arith.constant 0 : index
    %c0_14 = arith.constant 0 : index
    %9 = vector.load %arg2[%c0_12, %c0_13, %c0_14] : memref<9x8x8xbf16, #tpu.memory_space<vmem>>, vector<1x8x8xbf16>
    %10 = vector.shape_cast %9 : vector<1x8x8xbf16> to vector<8x8xbf16>
    %cst_15 = arith.constant dense<0.000000e+00> : vector<256x8xf32>
    %11 = tpu.matmul %8, %10, %cst_15 {dimension_numbers = #tpu.dot_dimension_numbers<[1], [0], [0], [1], [0, 0, 1, 1], [], []>} : vector<256x8xbf16>, vector<8x8xbf16>, vector<256x8xf32> -> vector<256x8xf32>
    %12 = arith.addf %5, %11 : vector<256x8xf32>
    %c0_16 = arith.constant 0 : index
    %c1_17 = arith.constant 1 : index
    %c0_18 = arith.constant 0 : index
    %13 = vector.load %arg6[%c0_16, %c1_17, %c0_18] : memref<18x18x8xf32, #tpu.memory_space<vmem>>, vector<16x16x8xf32>
    %14 = vector.shape_cast %13 : vector<16x16x8xf32> to vector<256x8xf32>
    %15 = arith.truncf %14 : vector<256x8xf32> to vector<256x8xbf16>
    %c1_19 = arith.constant 1 : index
    %c0_20 = arith.constant 0 : index
    %c0_21 = arith.constant 0 : index
    %16 = vector.load %arg2[%c1_19, %c0_20, %c0_21] : memref<9x8x8xbf16, #tpu.memory_space<vmem>>, vector<1x8x8xbf16>
    %17 = vector.shape_cast %16 : vector<1x8x8xbf16> to vector<8x8xbf16>
    %cst_22 = arith.constant dense<0.000000e+00> : vector<256x8xf32>
    %18 = tpu.matmul %15, %17, %cst_22 {dimension_numbers = #tpu.dot_dimension_numbers<[1], [0], [0], [1], [0, 0, 1, 1], [], []>} : vector<256x8xbf16>, vector<8x8xbf16>, vector<256x8xf32> -> vector<256x8xf32>
    %19 = arith.addf %12, %18 : vector<256x8xf32>
    %c0_23 = arith.constant 0 : index
    %c2 = arith.constant 2 : index
    %c0_24 = arith.constant 0 : index
    %20 = vector.load %arg6[%c0_23, %c2, %c0_24] : memref<18x18x8xf32, #tpu.memory_space<vmem>>, vector<16x16x8xf32>
    %21 = vector.shape_cast %20 : vector<16x16x8xf32> to vector<256x8xf32>
    %22 = arith.truncf %21 : vector<256x8xf32> to vector<256x8xbf16>
    %c2_25 = arith.constant 2 : index
    %c0_26 = arith.constant 0 : index
    %c0_27 = arith.constant 0 : index
    %23 = vector.load %arg2[%c2_25, %c0_26, %c0_27] : memref<9x8x8xbf16, #tpu.memory_space<vmem>>, vector<1x8x8xbf16>
    %24 = vector.shape_cast %23 : vector<1x8x8xbf16> to vector<8x8xbf16>
    %cst_28 = arith.constant dense<0.000000e+00> : vector<256x8xf32>
    %25 = tpu.matmul %22, %24, %cst_28 {dimension_numbers = #tpu.dot_dimension_numbers<[1], [0], [0], [1], [0, 0, 1, 1], [], []>} : vector<256x8xbf16>, vector<8x8xbf16>, vector<256x8xf32> -> vector<256x8xf32>
    %26 = arith.addf %19, %25 : vector<256x8xf32>
    %c1_29 = arith.constant 1 : index
    %c0_30 = arith.constant 0 : index
    %c0_31 = arith.constant 0 : index
    %27 = vector.load %arg6[%c1_29, %c0_30, %c0_31] : memref<18x18x8xf32, #tpu.memory_space<vmem>>, vector<16x16x8xf32>
    %28 = vector.shape_cast %27 : vector<16x16x8xf32> to vector<256x8xf32>
    %29 = arith.truncf %28 : vector<256x8xf32> to vector<256x8xbf16>
    %c3 = arith.constant 3 : index
    %c0_32 = arith.constant 0 : index
    %c0_33 = arith.constant 0 : index
    %30 = vector.load %arg2[%c3, %c0_32, %c0_33] : memref<9x8x8xbf16, #tpu.memory_space<vmem>>, vector<1x8x8xbf16>
    %31 = vector.shape_cast %30 : vector<1x8x8xbf16> to vector<8x8xbf16>
    %cst_34 = arith.constant dense<0.000000e+00> : vector<256x8xf32>
    %32 = tpu.matmul %29, %31, %cst_34 {dimension_numbers = #tpu.dot_dimension_numbers<[1], [0], [0], [1], [0, 0, 1, 1], [], []>} : vector<256x8xbf16>, vector<8x8xbf16>, vector<256x8xf32> -> vector<256x8xf32>
    %33 = arith.addf %26, %32 : vector<256x8xf32>
    %c1_35 = arith.constant 1 : index
    %c1_36 = arith.constant 1 : index
    %c0_37 = arith.constant 0 : index
    %34 = vector.load %arg6[%c1_35, %c1_36, %c0_37] : memref<18x18x8xf32, #tpu.memory_space<vmem>>, vector<16x16x8xf32>
    %35 = vector.shape_cast %34 : vector<16x16x8xf32> to vector<256x8xf32>
    %36 = arith.truncf %35 : vector<256x8xf32> to vector<256x8xbf16>
    %c4 = arith.constant 4 : index
    %c0_38 = arith.constant 0 : index
    %c0_39 = arith.constant 0 : index
    %37 = vector.load %arg2[%c4, %c0_38, %c0_39] : memref<9x8x8xbf16, #tpu.memory_space<vmem>>, vector<1x8x8xbf16>
    %38 = vector.shape_cast %37 : vector<1x8x8xbf16> to vector<8x8xbf16>
    %cst_40 = arith.constant dense<0.000000e+00> : vector<256x8xf32>
    %39 = tpu.matmul %36, %38, %cst_40 {dimension_numbers = #tpu.dot_dimension_numbers<[1], [0], [0], [1], [0, 0, 1, 1], [], []>} : vector<256x8xbf16>, vector<8x8xbf16>, vector<256x8xf32> -> vector<256x8xf32>
    %40 = arith.addf %33, %39 : vector<256x8xf32>
    %c1_41 = arith.constant 1 : index
    %c2_42 = arith.constant 2 : index
    %c0_43 = arith.constant 0 : index
    %41 = vector.load %arg6[%c1_41, %c2_42, %c0_43] : memref<18x18x8xf32, #tpu.memory_space<vmem>>, vector<16x16x8xf32>
    %42 = vector.shape_cast %41 : vector<16x16x8xf32> to vector<256x8xf32>
    %43 = arith.truncf %42 : vector<256x8xf32> to vector<256x8xbf16>
    %c5 = arith.constant 5 : index
    %c0_44 = arith.constant 0 : index
    %c0_45 = arith.constant 0 : index
    %44 = vector.load %arg2[%c5, %c0_44, %c0_45] : memref<9x8x8xbf16, #tpu.memory_space<vmem>>, vector<1x8x8xbf16>
    %45 = vector.shape_cast %44 : vector<1x8x8xbf16> to vector<8x8xbf16>
    %cst_46 = arith.constant dense<0.000000e+00> : vector<256x8xf32>
    %46 = tpu.matmul %43, %45, %cst_46 {dimension_numbers = #tpu.dot_dimension_numbers<[1], [0], [0], [1], [0, 0, 1, 1], [], []>} : vector<256x8xbf16>, vector<8x8xbf16>, vector<256x8xf32> -> vector<256x8xf32>
    %47 = arith.addf %40, %46 : vector<256x8xf32>
    %c2_47 = arith.constant 2 : index
    %c0_48 = arith.constant 0 : index
    %c0_49 = arith.constant 0 : index
    %48 = vector.load %arg6[%c2_47, %c0_48, %c0_49] : memref<18x18x8xf32, #tpu.memory_space<vmem>>, vector<16x16x8xf32>
    %49 = vector.shape_cast %48 : vector<16x16x8xf32> to vector<256x8xf32>
    %50 = arith.truncf %49 : vector<256x8xf32> to vector<256x8xbf16>
    %c6 = arith.constant 6 : index
    %c0_50 = arith.constant 0 : index
    %c0_51 = arith.constant 0 : index
    %51 = vector.load %arg2[%c6, %c0_50, %c0_51] : memref<9x8x8xbf16, #tpu.memory_space<vmem>>, vector<1x8x8xbf16>
    %52 = vector.shape_cast %51 : vector<1x8x8xbf16> to vector<8x8xbf16>
    %cst_52 = arith.constant dense<0.000000e+00> : vector<256x8xf32>
    %53 = tpu.matmul %50, %52, %cst_52 {dimension_numbers = #tpu.dot_dimension_numbers<[1], [0], [0], [1], [0, 0, 1, 1], [], []>} : vector<256x8xbf16>, vector<8x8xbf16>, vector<256x8xf32> -> vector<256x8xf32>
    %54 = arith.addf %47, %53 : vector<256x8xf32>
    %c2_53 = arith.constant 2 : index
    %c1_54 = arith.constant 1 : index
    %c0_55 = arith.constant 0 : index
    %55 = vector.load %arg6[%c2_53, %c1_54, %c0_55] : memref<18x18x8xf32, #tpu.memory_space<vmem>>, vector<16x16x8xf32>
    %56 = vector.shape_cast %55 : vector<16x16x8xf32> to vector<256x8xf32>
    %57 = arith.truncf %56 : vector<256x8xf32> to vector<256x8xbf16>
    %c7 = arith.constant 7 : index
    %c0_56 = arith.constant 0 : index
    %c0_57 = arith.constant 0 : index
    %58 = vector.load %arg2[%c7, %c0_56, %c0_57] : memref<9x8x8xbf16, #tpu.memory_space<vmem>>, vector<1x8x8xbf16>
    %59 = vector.shape_cast %58 : vector<1x8x8xbf16> to vector<8x8xbf16>
    %cst_58 = arith.constant dense<0.000000e+00> : vector<256x8xf32>
    %60 = tpu.matmul %57, %59, %cst_58 {dimension_numbers = #tpu.dot_dimension_numbers<[1], [0], [0], [1], [0, 0, 1, 1], [], []>} : vector<256x8xbf16>, vector<8x8xbf16>, vector<256x8xf32> -> vector<256x8xf32>
    %61 = arith.addf %54, %60 : vector<256x8xf32>
    %c2_59 = arith.constant 2 : index
    %c2_60 = arith.constant 2 : index
    %c0_61 = arith.constant 0 : index
    %62 = vector.load %arg6[%c2_59, %c2_60, %c0_61] : memref<18x18x8xf32, #tpu.memory_space<vmem>>, vector<16x16x8xf32>
    %63 = vector.shape_cast %62 : vector<16x16x8xf32> to vector<256x8xf32>
    %64 = arith.truncf %63 : vector<256x8xf32> to vector<256x8xbf16>
    %c8 = arith.constant 8 : index
    %c0_62 = arith.constant 0 : index
    %c0_63 = arith.constant 0 : index
    %65 = vector.load %arg2[%c8, %c0_62, %c0_63] : memref<9x8x8xbf16, #tpu.memory_space<vmem>>, vector<1x8x8xbf16>
    %66 = vector.shape_cast %65 : vector<1x8x8xbf16> to vector<8x8xbf16>
    %cst_64 = arith.constant dense<0.000000e+00> : vector<256x8xf32>
    %67 = tpu.matmul %64, %66, %cst_64 {dimension_numbers = #tpu.dot_dimension_numbers<[1], [0], [0], [1], [0, 0, 1, 1], [], []>} : vector<256x8xbf16>, vector<8x8xbf16>, vector<256x8xf32> -> vector<256x8xf32>
    %68 = arith.addf %61, %67 : vector<256x8xf32>
    %c0_65 = arith.constant 0 : index
    %c0_66 = arith.constant 0 : index
    %69 = vector.load %arg3[%c0_65, %c0_66] : memref<256x8xf32, #tpu.memory_space<vmem>>, vector<256x8xf32>
    tpu.vector_store %arg3[%c0_65, %c0_66], %68 {strides = array<i32>} : memref<256x8xf32, #tpu.memory_space<vmem>>, vector<256x8xf32>,
    %cst_67 = arith.constant dense<0.000000e+00> : vector<8xf32>
    %70 = vector.multi_reduction <add>, %68, %cst_67 [0] : vector<256x8xf32> to vector<8xf32>
    %71 = vector.shape_cast %70 : vector<8xf32> to vector<1x8xf32>
    %c0_68 = arith.constant 0 : index
    %c0_69 = arith.constant 0 : index
    %c0_70 = arith.constant 0 : index
    %72 = vector.load %arg4[%c0_68, %c0_69, %c0_70] : memref<1x1x8xf32, #tpu.memory_space<vmem>>, vector<1x1x8xf32>
    %73 = vector.shape_cast %72 : vector<1x1x8xf32> to vector<1x8xf32>
    %74 = vector.shape_cast %71 : vector<1x8xf32> to vector<1x1x8xf32>
    tpu.vector_store %arg4[%c0_68, %c0_69, %c0_70], %74 {strides = array<i32>} : memref<1x1x8xf32, #tpu.memory_space<vmem>>, vector<1x1x8xf32>,
    %75 = arith.mulf %68, %68 : vector<256x8xf32>
    %cst_71 = arith.constant dense<0.000000e+00> : vector<8xf32>
    %76 = vector.multi_reduction <add>, %75, %cst_71 [0] : vector<256x8xf32> to vector<8xf32>
    %77 = vector.shape_cast %76 : vector<8xf32> to vector<1x8xf32>
    %c0_72 = arith.constant 0 : index
    %c0_73 = arith.constant 0 : index
    %c0_74 = arith.constant 0 : index
    %78 = vector.load %arg5[%c0_72, %c0_73, %c0_74] : memref<1x1x8xf32, #tpu.memory_space<vmem>>, vector<1x1x8xf32>
    %79 = vector.shape_cast %78 : vector<1x1x8xf32> to vector<1x8xf32>
    %80 = vector.shape_cast %77 : vector<1x8xf32> to vector<1x1x8xf32>
    tpu.vector_store %arg5[%c0_72, %c0_73, %c0_74], %80 {strides = array<i32>} : memref<1x1x8xf32, #tpu.memory_space<vmem>>, vector<1x1x8xf32>,
    return
  }
  func.func @transform_0(%arg0: i32) -> (i32, i32, i32, i32) {
    %c0_i32 = arith.constant 0 : i32
    %c0_i32_0 = arith.constant 0 : i32
    %c0_i32_1 = arith.constant 0 : i32
    %c0_i32_2 = arith.constant 0 : i32
    return %arg0, %c0_i32, %c0_i32_0, %c0_i32_1 : i32, i32, i32, i32
  }
  func.func @transform_1(%arg0: i32) -> (i32, i32, i32) {
    %c0_i32 = arith.constant 0 : i32
    %c0_i32_0 = arith.constant 0 : i32
    %c0_i32_1 = arith.constant 0 : i32
    %c0_i32_2 = arith.constant 0 : i32
    return %c0_i32, %c0_i32_0, %c0_i32_1 : i32, i32, i32
  }
  func.func @transform_2(%arg0: i32) -> (i32, i32) {
    %c0_i32 = arith.constant 0 : i32
    %c0_i32_0 = arith.constant 0 : i32
    return %arg0, %c0_i32 : i32, i32
  }
  func.func @transform_3(%arg0: i32) -> (i32, i32, i32) {
    %c0_i32 = arith.constant 0 : i32
    %c0_i32_0 = arith.constant 0 : i32
    %c0_i32_1 = arith.constant 0 : i32
    return %arg0, %c0_i32, %c0_i32_0 : i32, i32, i32
  }
  func.func @transform_4(%arg0: i32) -> (i32, i32, i32) {
    %c0_i32 = arith.constant 0 : i32
    %c0_i32_0 = arith.constant 0 : i32
    %c0_i32_1 = arith.constant 0 : i32
    return %arg0, %c0_i32, %c0_i32_0 : i32, i32, i32
  }
}

module attributes {stable_mosaic.version = 11 : i64} {
  func.func @_bn_relu_add_kernel(%arg0: i32, %arg1: memref<256x8xf32, #tpu.memory_space<vmem>>, %arg2: memref<1x8xf32, #tpu.memory_space<vmem>>, %arg3: memref<1x8xf32, #tpu.memory_space<vmem>>, %arg4: memref<256x8xf32, #tpu.memory_space<vmem>>, %arg5: memref<256x8xf32, #tpu.memory_space<vmem>>) attributes {dimension_semantics = [#tpu.dimension_semantics<parallel>], iteration_bounds = array<i64: 2>, scalar_prefetch = 0 : i64, scratch_operands = 0 : i64, tpu.core_type = #tpu.core_type<tc>, window_params = [{transform_indices = @transform_0, window_bounds = array<i64: 256, 8>}, {pipeline_mode = #tpu.pipeline_mode<synchronous>, transform_indices = @transform_1, window_bounds = array<i64: 1, 8>}, {pipeline_mode = #tpu.pipeline_mode<synchronous>, transform_indices = @transform_2, window_bounds = array<i64: 1, 8>}, {transform_indices = @transform_3, window_bounds = array<i64: 256, 8>}, {transform_indices = @transform_4, window_bounds = array<i64: 256, 8>}]} {
    %c0 = arith.constant 0 : index
    %c0_0 = arith.constant 0 : index
    %0 = vector.load %arg1[%c0, %c0_0] : memref<256x8xf32, #tpu.memory_space<vmem>>, vector<256x8xf32>
    %c0_1 = arith.constant 0 : index
    %c0_2 = arith.constant 0 : index
    %1 = vector.load %arg2[%c0_1, %c0_2] : memref<1x8xf32, #tpu.memory_space<vmem>>, vector<1x8xf32>
    %2 = vector.broadcast %1 : vector<1x8xf32> to vector<256x8xf32>
    %3 = arith.mulf %0, %2 : vector<256x8xf32>
    %c0_3 = arith.constant 0 : index
    %c0_4 = arith.constant 0 : index
    %4 = vector.load %arg3[%c0_3, %c0_4] : memref<1x8xf32, #tpu.memory_space<vmem>>, vector<1x8xf32>
    %5 = vector.broadcast %4 : vector<1x8xf32> to vector<256x8xf32>
    %6 = arith.addf %3, %5 : vector<256x8xf32>
    %c0_5 = arith.constant 0 : index
    %c0_6 = arith.constant 0 : index
    %7 = vector.load %arg4[%c0_5, %c0_6] : memref<256x8xf32, #tpu.memory_space<vmem>>, vector<256x8xf32>
    %cst = arith.constant 0.000000e+00 : f32
    %8 = vector.broadcast %cst : f32 to vector<256x8xf32>
    %9 = arith.maximumf %6, %8 : vector<256x8xf32>
    %10 = arith.addf %7, %9 : vector<256x8xf32>
    %c0_7 = arith.constant 0 : index
    %c0_8 = arith.constant 0 : index
    %11 = vector.load %arg5[%c0_7, %c0_8] : memref<256x8xf32, #tpu.memory_space<vmem>>, vector<256x8xf32>
    tpu.vector_store %arg5[%c0_7, %c0_8], %10 {strides = array<i32>} : memref<256x8xf32, #tpu.memory_space<vmem>>, vector<256x8xf32>,
    return
  }
  func.func @transform_0(%arg0: i32) -> (i32, i32) {
    %c0_i32 = arith.constant 0 : i32
    %c0_i32_0 = arith.constant 0 : i32
    return %arg0, %c0_i32 : i32, i32
  }
  func.func @transform_1(%arg0: i32) -> (i32, i32) {
    %c0_i32 = arith.constant 0 : i32
    %c0_i32_0 = arith.constant 0 : i32
    %c0_i32_1 = arith.constant 0 : i32
    return %c0_i32, %c0_i32_0 : i32, i32
  }
  func.func @transform_2(%arg0: i32) -> (i32, i32) {
    %c0_i32 = arith.constant 0 : i32
    %c0_i32_0 = arith.constant 0 : i32
    %c0_i32_1 = arith.constant 0 : i32
    return %c0_i32, %c0_i32_0 : i32, i32
  }
  func.func @transform_3(%arg0: i32) -> (i32, i32) {
    %c0_i32 = arith.constant 0 : i32
    %c0_i32_0 = arith.constant 0 : i32
    return %arg0, %c0_i32 : i32, i32
  }
  func.func @transform_4(%arg0: i32) -> (i32, i32) {
    %c0_i32 = arith.constant 0 : i32
    %c0_i32_0 = arith.constant 0 : i32
    return %arg0, %c0_i32 : i32, i32
  }
}

module attributes {stable_mosaic.version = 11 : i64} {
  func.func @_bn_relu_kernel(%arg0: i32, %arg1: memref<256x8xf32, #tpu.memory_space<vmem>>, %arg2: memref<1x8xf32, #tpu.memory_space<vmem>>, %arg3: memref<1x8xf32, #tpu.memory_space<vmem>>, %arg4: memref<256x8xf32, #tpu.memory_space<vmem>>) attributes {dimension_semantics = [#tpu.dimension_semantics<parallel>], iteration_bounds = array<i64: 2>, scalar_prefetch = 0 : i64, scratch_operands = 0 : i64, tpu.core_type = #tpu.core_type<tc>, window_params = [{transform_indices = @transform_0, window_bounds = array<i64: 256, 8>}, {pipeline_mode = #tpu.pipeline_mode<synchronous>, transform_indices = @transform_1, window_bounds = array<i64: 1, 8>}, {pipeline_mode = #tpu.pipeline_mode<synchronous>, transform_indices = @transform_2, window_bounds = array<i64: 1, 8>}, {transform_indices = @transform_3, window_bounds = array<i64: 256, 8>}]} {
    %c0 = arith.constant 0 : index
    %c0_0 = arith.constant 0 : index
    %0 = vector.load %arg1[%c0, %c0_0] : memref<256x8xf32, #tpu.memory_space<vmem>>, vector<256x8xf32>
    %c0_1 = arith.constant 0 : index
    %c0_2 = arith.constant 0 : index
    %1 = vector.load %arg2[%c0_1, %c0_2] : memref<1x8xf32, #tpu.memory_space<vmem>>, vector<1x8xf32>
    %2 = vector.broadcast %1 : vector<1x8xf32> to vector<256x8xf32>
    %3 = arith.mulf %0, %2 : vector<256x8xf32>
    %c0_3 = arith.constant 0 : index
    %c0_4 = arith.constant 0 : index
    %4 = vector.load %arg3[%c0_3, %c0_4] : memref<1x8xf32, #tpu.memory_space<vmem>>, vector<1x8xf32>
    %5 = vector.broadcast %4 : vector<1x8xf32> to vector<256x8xf32>
    %6 = arith.addf %3, %5 : vector<256x8xf32>
    %cst = arith.constant 0.000000e+00 : f32
    %7 = vector.broadcast %cst : f32 to vector<256x8xf32>
    %8 = arith.maximumf %6, %7 : vector<256x8xf32>
    %c0_5 = arith.constant 0 : index
    %c0_6 = arith.constant 0 : index
    %9 = vector.load %arg4[%c0_5, %c0_6] : memref<256x8xf32, #tpu.memory_space<vmem>>, vector<256x8xf32>
    tpu.vector_store %arg4[%c0_5, %c0_6], %8 {strides = array<i32>} : memref<256x8xf32, #tpu.memory_space<vmem>>, vector<256x8xf32>,
    return
  }
  func.func @transform_0(%arg0: i32) -> (i32, i32) {
    %c0_i32 = arith.constant 0 : i32
    %c0_i32_0 = arith.constant 0 : i32
    return %arg0, %c0_i32 : i32, i32
  }
  func.func @transform_1(%arg0: i32) -> (i32, i32) {
    %c0_i32 = arith.constant 0 : i32
    %c0_i32_0 = arith.constant 0 : i32
    %c0_i32_1 = arith.constant 0 : i32
    return %c0_i32, %c0_i32_0 : i32, i32
  }
  func.func @transform_2(%arg0: i32) -> (i32, i32) {
    %c0_i32 = arith.constant 0 : i32
    %c0_i32_0 = arith.constant 0 : i32
    %c0_i32_1 = arith.constant 0 : i32
    return %c0_i32, %c0_i32_0 : i32, i32
  }
  func.func @transform_3(%arg0: i32) -> (i32, i32) {
    %c0_i32 = arith.constant 0 : i32
    %c0_i32_0 = arith.constant 0 : i32
    return %arg0, %c0_i32 : i32, i32
  }
}

</mosaic_0001>

<bundles_post_ra>
// kernel: rrcnn_block.9
= control target key start
LH: loop header
LB: loop body
LE: loop exit
PB: predicated region body
PF: predicated region fallthrough
CT: control target
= control target key end

     0   :  { %s653_s12 = smov 0   ;;  %s833_s0 = inlined_call_operand.vmem [shape: f32[512,4], index: 0, kind: input, shape index: {}]   ;;  %s834_s1 = inlined_call_operand.vmem [shape: bf16[4,8], index: 1, kind: input, shape index: {}]   ;;  %s835_s2 = inlined_call_operand.vmem [shape: f32[1,8], index: 2, kind: input, shape index: {}]   ;;  %s836_s3 = inlined_call_operand.vmem [shape: f32[512,8], index: 3, kind: output, shape index: {}]  }
   0x1 LB: > { %s534_s13 = sadd.s32 4294967295, %s631_s12   ;;  %p538_p0 = scmp.ge.s32.totalorder %s631_s12, 1  ;;  %s631_s12 = sphi %s653_s12, %s13_s12  }
   0x2   : > { %p138_p1 = scmp.lt.s32.totalorder %s631_s12, 3 }
   0x4   : > { %p139_p2 = pnand %p538_p0, %p138_p1 }
   0x5   : > { %v223_v0 = vld [vmem:[%s834_s1] sm:$0x3] (!%p139_p2)  ;;  %vm280_vm0 = vcmask (!%p139_p2), 1041408   ;;  %s539_s16 = sshll.u32 (!%p139_p2), %s534_s13, 5  ;;  %vm231_vm1 = vcmask (!%p139_p2), 31744   ;;  %vm445_vm2 = vcmask (!%p139_p2), 64512  }
   0x6   : > { %142 = sbr.rel (%p139_p2) target bundleno = 263 (0x107), region = 32  ;;  %615 = vmatprep.subr.msk.bf16.mxu0 (!%p139_p2), %vm280_vm0, %v223_v0  ;;  %616 = vmatprep.subr.msk.bf16.mxu1 (!%p139_p2), %vm280_vm0, %v223_v0  ;;  %v282_v1 = vsel (!%p139_p2), %vm280_vm0, %v223_v0, 0  ;;  %p163_p3 = scmp.lt.s32.totalorder (!%p139_p2), %s539_s16, 63  ;;  %v725_v50 = vld [vmem:[%s835_s2] ss:$0 sm:$0xff] (!%p139_p2) }
   0x7   : > { %580 = vmatpush3.bf16.msra.mxu0 (!%p139_p2), %v282_v1  ;;  %614 = vmatpush3.bf16.msra.mxu1 (!%p139_p2), %v282_v1 }
   0xd   : > { %s838_s16 = smov (!%p163_p3, %s539_s16), 63 }
   0xe   : > { %s540_s17 = sshll.u32 %s838_s16, 3 }
   0xf   : > { %s672_s20 = scalar_lea.vmem %s833_s0, %s540_s17  ;;  %s732_s25 = scalar_lea.vmem %s836_s3, %s540_s17 }
  0x10   : > { %v175_v2 = vld [vmem:[%s672_s20] sm:$0xff]  ;;  %v176_v3 = vld [vmem:[%s672_s20 + $0x8] sm:$0xff]  ;;  %v177_v7 = vld [vmem:[%s672_s20 + $0x10] sm:$0xff] }
  0x11   : > { %v191_v4 = vld [vmem:[%s672_s20 + $0x80] sm:$0xff]  ;;  %v207_v5 = vpack.c.bf16 %v176_v3, %v175_v2  ;;  %v192_v6 = vld [vmem:[%s672_s20 + $0x88] sm:$0xff]  ;;  %v178_v8 = vld [vmem:[%s672_s20 + $0x18] sm:$0xff] }
  0x12   : > { %v215_v9 = vpack.c.bf16 %v192_v6, %v191_v4  ;;  %v208_v10 = vpack.c.bf16 %v178_v8, %v177_v7  ;;  %v193_v11 = vld [vmem:[%s672_s20 + $0x90] sm:$0xff]  ;;  %v194_v12 = vld [vmem:[%s672_s20 + $0x98] sm:$0xff]  ;;  %v179_v13 = vld [vmem:[%s672_s20 + $0x20] sm:$0xff] }
  0x13   : > { %581 = vmatprep.mubr.msk.bf16.mxu0 %vm231_vm1, %v207_v5  ;;  %v216_v14 = vpack.c.bf16 %v194_v12, %v193_v11  ;;  %v180_v15 = vld [vmem:[%s672_s20 + $0x28] sm:$0xff]  ;;  %v195_v16 = vld [vmem:[%s672_s20 + $0xa0] sm:$0xff]  ;;  %v181_v20 = vld [vmem:[%s672_s20 + $0x30] sm:$0xff] }
  0x14   : > { %v196_v17 = vld [vmem:[%s672_s20 + $0xa8] sm:$0xff]  ;;  %597 = vmatprep.mubr.msk.bf16.mxu1 %vm231_vm1, %v215_v9  ;;  %582 = vmatmul.mubr.msk.bf16.vlgmr.msra.gmra.mrb[0].mxu0 %vm231_vm1, %v208_v10  ;;  %v209_v18 = vpack.c.bf16 %v180_v15, %v179_v13  ;;  %v182_v21 = vld [vmem:[%s672_s20 + $0x38] sm:$0xff]  ;;  %v197_v22 = vld [vmem:[%s672_s20 + $0xb0] sm:$0xff] }
  0x15   : > { %v217_v19 = vpack.c.bf16 %v196_v17, %v195_v16  ;;  %598 = vmatmul.mubr.msk.bf16.vlgmr.msra.gmra.mrb[0].mxu1 %vm231_vm1, %v216_v14  ;;  %v198_v23 = vld [vmem:[%s672_s20 + $0xb8] sm:$0xff]  ;;  %v183_v24 = vld [vmem:[%s672_s20 + $0x40] sm:$0xff]  ;;  %v184_v25 = vld [vmem:[%s672_s20 + $0x48] sm:$0xff]  ;;  %v210_v28 = vpack.c.bf16 %v182_v21, %v181_v20 }
  0x16   : > { %585 = vmatprep.mubr.msk.bf16.mxu0 %vm231_vm1, %v209_v18  ;;  %v199_v26 = vld [vmem:[%s672_s20 + $0xc0] sm:$0xff]  ;;  %v200_v27 = vld [vmem:[%s672_s20 + $0xc8] sm:$0xff]  ;;  %v218_v29 = vpack.c.bf16 %v198_v23, %v197_v22  ;;  %v211_v30 = vpack.c.bf16 %v184_v25, %v183_v24  ;;  %v185_v32 = vld [vmem:[%s672_s20 + $0x50] sm:$0xff] }
  0x17   : > { %601 = vmatprep.mubr.msk.bf16.mxu1 %vm231_vm1, %v217_v19  ;;  %v219_v31 = vpack.c.bf16 %v200_v27, %v199_v26  ;;  %v186_v33 = vld [vmem:[%s672_s20 + $0x58] sm:$0xff]  ;;  %v201_v34 = vld [vmem:[%s672_s20 + $0xd0] sm:$0xff]  ;;  %v187_v36 = vld [vmem:[%s672_s20 + $0x60] sm:$0xff] }
  0x18   : > { %v202_v35 = vld [vmem:[%s672_s20 + $0xd8] sm:$0xff]  ;;  %v188_v37 = vld [vmem:[%s672_s20 + $0x68] sm:$0xff]  ;;  %v203_v38 = vld [vmem:[%s672_s20 + $0xe0] sm:$0xff]  ;;  %v212_v40 = vpack.c.bf16 %v186_v33, %v185_v32 }
  0x19   : > { %v204_v39 = vld [vmem:[%s672_s20 + $0xe8] sm:$0xff]  ;;  %v220_v41 = vpack.c.bf16 %v202_v35, %v201_v34  ;;  %v213_v42 = vpack.c.bf16 %v188_v37, %v187_v36  ;;  %v189_v44 = vld [vmem:[%s672_s20 + $0x70] sm:$0xff]  ;;  %v190_v45 = vld [vmem:[%s672_s20 + $0x78] sm:$0xff] }
  0x1a   : > { %v221_v43 = vpack.c.bf16 %v204_v39, %v203_v38  ;;  %v205_v46 = vld [vmem:[%s672_s20 + $0xf0] sm:$0xff]  ;;  %v206_v47 = vld [vmem:[%s672_s20 + $0xf8] sm:$0xff]  ;;  %v214_v48 = vpack.c.bf16 %v190_v45, %v189_v44 }
  0x1b   : > { %v222_v49 = vpack.c.bf16 %v206_v47, %v205_v46 }
  0x1c   : > { %586 = vmatmul.mubr.msk.bf16.gmra.mrb[4].mxu0 %vm231_vm1, %v210_v28 }
  0x1d   : > { %602 = vmatmul.mubr.msk.bf16.gmra.mrb[4].mxu1 %vm231_vm1, %v218_v29  ;;  %589 = vmatprep.mubr.msk.bf16.mxu0 %vm231_vm1, %v211_v30 }
  0x1e   : > { %605 = vmatprep.mubr.msk.bf16.mxu1 %vm231_vm1, %v219_v31 }
  0x24   : > { %590 = vmatmul.mubr.msk.bf16.gmra.mrb[8].mxu0 %vm231_vm1, %v212_v40 }
  0x25   : > { %606 = vmatmul.mubr.msk.bf16.gmra.mrb[8].mxu1 %vm231_vm1, %v220_v41  ;;  %593 = vmatprep.mubr.msk.bf16.mxu0 %vm231_vm1, %v213_v42 }
  0x26   : > { %609 = vmatprep.mubr.msk.bf16.mxu1 %vm231_vm1, %v221_v43 }
  0x2c   : > { %594 = vmatmul.mubr.msk.bf16.gmra.mrb[12].mxu0 %vm231_vm1, %v214_v48 }
  0x2d   : > { %610 = vmatmul.mubr.msk.bf16.gmra.mrb[12].mxu1 %vm231_vm1, %v222_v49 }
  0xe7   : > { %v583_v51 = vpop.f32.mrb[0].mxu0 }
  0xe8   : > { %v327_v52 = vadd.f32 %v583_v51, %v725_v50  ;;  %v599_v53 = vpop.f32.mrb[0].mxu1  ;;  %v318_v54 = vpop.f32.mrb[1].mxu0 }
  0xe9   : > { %v391_v55 = vadd.f32 %v599_v53, %v725_v50  ;;  %v319_v56 = vadd.f32 %v725_v50, %v318_v54  ;;  %v382_v57 = vpop.f32.mrb[1].mxu1  ;;  %v584_v58 = vpop.f32.mrb[2].mxu0 }
  0xea   : > { %448 = vst.msk [vmem:[%s732_s25 + $0x10] sm:$0xff] %vm445_vm2, %v327_v52  ;;  %v383_v59 = vadd.f32 %v725_v50, %v382_v57  ;;  %v330_v60 = vadd.f32 %v584_v58, %v725_v50  ;;  %v600_v61 = vpop.f32.mrb[2].mxu1  ;;  %v321_v62 = vpop.f32.mrb[3].mxu0 }
  0xeb   : > { %464 = vst.msk [vmem:[%s732_s25 + $0x90] sm:$0xff] %vm445_vm2, %v391_v55  ;;  %446 = vst.msk [vmem:[%s732_s25] sm:$0xff] %vm445_vm2, %v319_v56  ;;  %v394_v63 = vadd.f32 %v600_v61, %v725_v50  ;;  %v322_v0 = vadd.f32 %v725_v50, %v321_v62  ;;  %v385_v1 = vpop.f32.mrb[3].mxu1 }
  0xec   : > { %462 = vst.msk [vmem:[%s732_s25 + $0x80] sm:$0xff] %vm445_vm2, %v383_v59  ;;  %449 = vst.msk [vmem:[%s732_s25 + $0x18] sm:$0xff] %vm445_vm2, %v330_v60  ;;  %v386_v2 = vadd.f32 %v725_v50, %v385_v1 }
  0xed   : > { %465 = vst.msk [vmem:[%s732_s25 + $0x98] sm:$0xff] %vm445_vm2, %v394_v63  ;;  %447 = vst.msk [vmem:[%s732_s25 + $0x8] sm:$0xff] %vm445_vm2, %v322_v0 }
  0xee   : > { %463 = vst.msk [vmem:[%s732_s25 + $0x88] sm:$0xff] %vm445_vm2, %v386_v2 }
  0xef   : > { %v587_v3 = vpop.f32.mrb[4].mxu0 }
  0xf0   : > { %v343_v4 = vadd.f32 %v587_v3, %v725_v50  ;;  %v603_v5 = vpop.f32.mrb[4].mxu1  ;;  %v334_v6 = vpop.f32.mrb[5].mxu0 }
  0xf1   : > { %v407_v7 = vadd.f32 %v603_v5, %v725_v50  ;;  %v335_v8 = vadd.f32 %v725_v50, %v334_v6  ;;  %v398_v9 = vpop.f32.mrb[5].mxu1  ;;  %v588_v10 = vpop.f32.mrb[6].mxu0 }
  0xf2   : > { %452 = vst.msk [vmem:[%s732_s25 + $0x30] sm:$0xff] %vm445_vm2, %v343_v4  ;;  %v399_v11 = vadd.f32 %v725_v50, %v398_v9  ;;  %v346_v12 = vadd.f32 %v588_v10, %v725_v50  ;;  %v604_v13 = vpop.f32.mrb[6].mxu1  ;;  %v337_v14 = vpop.f32.mrb[7].mxu0 }
  0xf3   : > { %468 = vst.msk [vmem:[%s732_s25 + $0xb0] sm:$0xff] %vm445_vm2, %v407_v7  ;;  %450 = vst.msk [vmem:[%s732_s25 + $0x20] sm:$0xff] %vm445_vm2, %v335_v8  ;;  %v410_v15 = vadd.f32 %v604_v13, %v725_v50  ;;  %v338_v16 = vadd.f32 %v725_v50, %v337_v14  ;;  %v401_v17 = vpop.f32.mrb[7].mxu1 }
  0xf4   : > { %466 = vst.msk [vmem:[%s732_s25 + $0xa0] sm:$0xff] %vm445_vm2, %v399_v11  ;;  %453 = vst.msk [vmem:[%s732_s25 + $0x38] sm:$0xff] %vm445_vm2, %v346_v12  ;;  %v402_v18 = vadd.f32 %v725_v50, %v401_v17 }
  0xf5   : > { %469 = vst.msk [vmem:[%s732_s25 + $0xb8] sm:$0xff] %vm445_vm2, %v410_v15  ;;  %451 = vst.msk [vmem:[%s732_s25 + $0x28] sm:$0xff] %vm445_vm2, %v338_v16 }
  0xf6   : > { %467 = vst.msk [vmem:[%s732_s25 + $0xa8] sm:$0xff] %vm445_vm2, %v402_v18 }
  0xf7   : > { %v591_v19 = vpop.f32.mrb[8].mxu0 }
  0xf8   : > { %v359_v20 = vadd.f32 %v591_v19, %v725_v50  ;;  %v607_v21 = vpop.f32.mrb[8].mxu1  ;;  %v350_v22 = vpop.f32.mrb[9].mxu0 }
  0xf9   : > { %v423_v23 = vadd.f32 %v607_v21, %v725_v50  ;;  %v351_v24 = vadd.f32 %v725_v50, %v350_v22  ;;  %v414_v25 = vpop.f32.mrb[9].mxu1  ;;  %v592_v26 = vpop.f32.mrb[10].mxu0 }
  0xfa   : > { %456 = vst.msk [vmem:[%s732_s25 + $0x50] sm:$0xff] %vm445_vm2, %v359_v20  ;;  %v415_v27 = vadd.f32 %v725_v50, %v414_v25  ;;  %v362_v28 = vadd.f32 %v592_v26, %v725_v50  ;;  %v608_v29 = vpop.f32.mrb[10].mxu1  ;;  %v353_v30 = vpop.f32.mrb[11].mxu0 }
  0xfb   : > { %472 = vst.msk [vmem:[%s732_s25 + $0xd0] sm:$0xff] %vm445_vm2, %v423_v23  ;;  %454 = vst.msk [vmem:[%s732_s25 + $0x40] sm:$0xff] %vm445_vm2, %v351_v24  ;;  %v426_v31 = vadd.f32 %v608_v29, %v725_v50  ;;  %v354_v32 = vadd.f32 %v725_v50, %v353_v30  ;;  %v417_v33 = vpop.f32.mrb[11].mxu1 }
  0xfc   : > { %470 = vst.msk [vmem:[%s732_s25 + $0xc0] sm:$0xff] %vm445_vm2, %v415_v27  ;;  %457 = vst.msk [vmem:[%s732_s25 + $0x58] sm:$0xff] %vm445_vm2, %v362_v28  ;;  %v418_v34 = vadd.f32 %v725_v50, %v417_v33 }
  0xfd   : > { %473 = vst.msk [vmem:[%s732_s25 + $0xd8] sm:$0xff] %vm445_vm2, %v426_v31  ;;  %455 = vst.msk [vmem:[%s732_s25 + $0x48] sm:$0xff] %vm445_vm2, %v354_v32 }
  0xfe   : > { %471 = vst.msk [vmem:[%s732_s25 + $0xc8] sm:$0xff] %vm445_vm2, %v418_v34 }
  0xff   : > { %v595_v35 = vpop.f32.mrb[12].mxu0 }
 0x100   : > { %v375_v36 = vadd.f32 %v595_v35, %v725_v50  ;;  %v611_v37 = vpop.f32.mrb[12].mxu1  ;;  %v366_v38 = vpop.f32.mrb[13].mxu0 }
 0x101   : > { %v439_v39 = vadd.f32 %v611_v37, %v725_v50  ;;  %v367_v40 = vadd.f32 %v725_v50, %v366_v38  ;;  %v430_v41 = vpop.f32.mrb[13].mxu1  ;;  %v596_v42 = vpop.f32.mrb[14].mxu0 }
 0x102   : > { %460 = vst.msk [vmem:[%s732_s25 + $0x70] sm:$0xff] %vm445_vm2, %v375_v36  ;;  %v431_v43 = vadd.f32 %v725_v50, %v430_v41  ;;  %v378_v44 = vadd.f32 %v596_v42, %v725_v50  ;;  %v612_v45 = vpop.f32.mrb[14].mxu1  ;;  %v369_v46 = vpop.f32.mrb[15].mxu0 }
 0x103   : > { %476 = vst.msk [vmem:[%s732_s25 + $0xf0] sm:$0xff] %vm445_vm2, %v439_v39  ;;  %458 = vst.msk [vmem:[%s732_s25 + $0x60] sm:$0xff] %vm445_vm2, %v367_v40  ;;  %v442_v47 = vadd.f32 %v612_v45, %v725_v50  ;;  %v370_v48 = vadd.f32 %v725_v50, %v369_v46  ;;  %v433_v49 = vpop.f32.mrb[15].mxu1 }
 0x104   : > { %474 = vst.msk [vmem:[%s732_s25 + $0xe0] sm:$0xff] %vm445_vm2, %v431_v43  ;;  %461 = vst.msk [vmem:[%s732_s25 + $0x78] sm:$0xff] %vm445_vm2, %v378_v44  ;;  %v434_v51 = vadd.f32 %v725_v50, %v433_v49 }
 0x105   : > { %477 = vst.msk [vmem:[%s732_s25 + $0xf8] sm:$0xff] %vm445_vm2, %v442_v47  ;;  %459 = vst.msk [vmem:[%s732_s25 + $0x68] sm:$0xff] %vm445_vm2, %v370_v48 }
 0x106   : > { %475 = vst.msk [vmem:[%s732_s25 + $0xe8] sm:$0xff] %vm445_vm2, %v434_v51 }
 0x107 PF: > { %s13_s12 = sadd.s32 1, %s631_s12  }
 0x108   : > { %p10_p4 = scmp.ge.s32.totalorder %s13_s12, 4  }
 0x10a   :  { %12 = sbr.rel (!%p10_p4) target bundleno = 1 (0x1), region = 62 }

// kernel: rrcnn_block.13
= control target key start
LH: loop header
LB: loop body
LE: loop exit
PB: predicated region body
PF: predicated region fallthrough
CT: control target
= control target key end

     0   :  { %s454_s12 = smov 0   ;;  %s645_s0 = inlined_call_operand.vmem [shape: f32[512,8], index: 0, kind: input, shape index: {}]   ;;  %s646_s1 = inlined_call_operand.vmem [shape: f32[1,8], index: 1, kind: input, shape index: {}]   ;;  %s647_s2 = inlined_call_operand.vmem [shape: f32[1,8], index: 2, kind: input, shape index: {}]   ;;  %s648_s3 = inlined_call_operand.vmem [shape: f32[512,8], index: 3, kind: output, shape index: {}]  }
   0x1 LB: > { %s405_s13 = sadd.s32 4294967295, %s432_s12   ;;  %p409_p0 = scmp.ge.s32.totalorder %s432_s12, 1  ;;  %s432_s12 = sphi %s454_s12, %s13_s12  }
   0x2   : > { %p138_p1 = scmp.lt.s32.totalorder %s432_s12, 3 }
   0x4   : > { %p139_p2 = pnand %p409_p0, %p138_p1 }
   0x5   : > { %s410_s14 = sshll.u32 (!%p139_p2), %s405_s13, 5  ;;  %v465_v0 = vld [vmem:[%s646_s1] ss:$0 sm:$0xff] (!%p139_p2)  ;;  %vm316_vm0 = vcmask (!%p139_p2), 64512  }
   0x6   : > { %142 = sbr.rel (%p139_p2) target bundleno = 46 (0x2e), region = 32  ;;  %p163_p3 = scmp.lt.s32.totalorder (!%p139_p2), %s410_s14, 63  ;;  %v475_v1 = vld [vmem:[%s647_s2] ss:$0 sm:$0xff] (!%p139_p2) }
   0xd   : > { %s650_s14 = smov (!%p163_p3, %s410_s14), 63 }
   0xe   : > { %s411_s15 = sshll.u32 %s650_s14, 3 }
   0xf   : > { %s470_s20 = scalar_lea.vmem %s645_s0, %s411_s15  ;;  %s498_s25 = scalar_lea.vmem %s648_s3, %s411_s15 }
  0x10   : > { %v174_v2 = vld [vmem:[%s470_s20] sm:$0xff]  ;;  %v175_v3 = vld [vmem:[%s470_s20 + $0x8] sm:$0xff]  ;;  %v176_v4 = vld [vmem:[%s470_s20 + $0x10] sm:$0xff] }
  0x11   : > { %v213_v5 = vmul.f32 %v465_v0, %v174_v2  ;;  %v214_v6 = vmul.f32 %v465_v0, %v175_v3  ;;  %v215_v7 = vmul.f32 %v465_v0, %v176_v4  ;;  %v177_v8 = vld [vmem:[%s470_s20 + $0x18] sm:$0xff]  ;;  %v178_v9 = vld [vmem:[%s470_s20 + $0x20] sm:$0xff]  ;;  %v179_v10 = vld [vmem:[%s470_s20 + $0x28] sm:$0xff] }
  0x12   : > { %v216_v11 = vmul.f32 %v465_v0, %v177_v8  ;;  %v217_v12 = vmul.f32 %v465_v0, %v178_v9  ;;  %v218_v13 = vmul.f32 %v465_v0, %v179_v10  ;;  %v180_v14 = vld [vmem:[%s470_s20 + $0x30] sm:$0xff]  ;;  %v181_v15 = vld [vmem:[%s470_s20 + $0x38] sm:$0xff]  ;;  %v182_v24 = vld [vmem:[%s470_s20 + $0x40] sm:$0xff] }
  0x13   : > { %v252_v16 = vadd.f32 %v475_v1, %v213_v5  ;;  %v253_v17 = vadd.f32 %v475_v1, %v214_v6  ;;  %v254_v18 = vadd.f32 %v475_v1, %v215_v7  ;;  %v219_v19 = vmul.f32 %v465_v0, %v180_v14  ;;  %v183_v25 = vld [vmem:[%s470_s20 + $0x48] sm:$0xff]  ;;  %v184_v26 = vld [vmem:[%s470_s20 + $0x50] sm:$0xff]  ;;  %v185_v31 = vld [vmem:[%s470_s20 + $0x58] sm:$0xff] }
  0x14   : > { %v255_v20 = vadd.f32 %v475_v1, %v216_v11  ;;  %v256_v21 = vadd.f32 %v475_v1, %v217_v12  ;;  %v257_v22 = vadd.f32 %v475_v1, %v218_v13  ;;  %v220_v23 = vmul.f32 %v465_v0, %v181_v15  ;;  %v186_v32 = vld [vmem:[%s470_s20 + $0x60] sm:$0xff]  ;;  %v187_v33 = vld [vmem:[%s470_s20 + $0x68] sm:$0xff]  ;;  %v188_v38 = vld [vmem:[%s470_s20 + $0x70] sm:$0xff] }
  0x15   : > { %v284_v27 = vmax.f32 %v252_v16, 0.0  ;;  %v285_v28 = vmax.f32 %v253_v17, 0.0  ;;  %v286_v29 = vmax.f32 %v254_v18, 0.0  ;;  %v258_v30 = vadd.f32 %v475_v1, %v219_v19  ;;  %v189_v43 = vld [vmem:[%s470_s20 + $0x78] sm:$0xff]  ;;  %v190_v56 = vld [vmem:[%s470_s20 + $0x80] sm:$0xff]  ;;  %v191_v57 = vld [vmem:[%s470_s20 + $0x88] sm:$0xff] }
  0x16   : > { %v287_v34 = vmax.f32 %v255_v20, 0.0  ;;  %v288_v35 = vmax.f32 %v256_v21, 0.0  ;;  %v289_v36 = vmax.f32 %v257_v22, 0.0  ;;  %v259_v37 = vadd.f32 %v475_v1, %v220_v23  ;;  %v192_v58 = vld [vmem:[%s470_s20 + $0x90] sm:$0xff]  ;;  %v193_v63 = vld [vmem:[%s470_s20 + $0x98] sm:$0xff]  ;;  %v194_v2 = vld [vmem:[%s470_s20 + $0xa0] sm:$0xff] }
  0x17   : > { %317 = vst.msk [vmem:[%s498_s25] sm:$0xff] %vm316_vm0, %v284_v27  ;;  %318 = vst.msk [vmem:[%s498_s25 + $0x8] sm:$0xff] %vm316_vm0, %v285_v28  ;;  %v290_v39 = vmax.f32 %v258_v30, 0.0  ;;  %v221_v40 = vmul.f32 %v465_v0, %v182_v24  ;;  %v222_v41 = vmul.f32 %v465_v0, %v183_v25  ;;  %v223_v42 = vmul.f32 %v465_v0, %v184_v26  ;;  %v195_v3 = vld [vmem:[%s470_s20 + $0xa8] sm:$0xff]  ;;  %v196_v8 = vld [vmem:[%s470_s20 + $0xb0] sm:$0xff] }
  0x18   : > { %319 = vst.msk [vmem:[%s498_s25 + $0x10] sm:$0xff] %vm316_vm0, %v286_v29  ;;  %320 = vst.msk [vmem:[%s498_s25 + $0x18] sm:$0xff] %vm316_vm0, %v287_v34  ;;  %v291_v44 = vmax.f32 %v259_v37, 0.0  ;;  %v224_v45 = vmul.f32 %v465_v0, %v185_v31  ;;  %v225_v46 = vmul.f32 %v465_v0, %v186_v32  ;;  %v226_v47 = vmul.f32 %v465_v0, %v187_v33  ;;  %v197_v13 = vld [vmem:[%s470_s20 + $0xb8] sm:$0xff]  ;;  %v198_v26 = vld [vmem:[%s470_s20 + $0xc0] sm:$0xff] }
  0x19   : > { %321 = vst.msk [vmem:[%s498_s25 + $0x20] sm:$0xff] %vm316_vm0, %v288_v35  ;;  %322 = vst.msk [vmem:[%s498_s25 + $0x28] sm:$0xff] %vm316_vm0, %v289_v36  ;;  %v260_v48 = vadd.f32 %v475_v1, %v221_v40  ;;  %v261_v49 = vadd.f32 %v475_v1, %v222_v41  ;;  %v262_v50 = vadd.f32 %v475_v1, %v223_v42  ;;  %v199_v27 = vld [vmem:[%s470_s20 + $0xc8] sm:$0xff]  ;;  %v200_v28 = vld [vmem:[%s470_s20 + $0xd0] sm:$0xff] }
  0x1a   : > { %323 = vst.msk [vmem:[%s498_s25 + $0x30] sm:$0xff] %vm316_vm0, %v290_v39  ;;  %v227_v51 = vmul.f32 %v465_v0, %v188_v38  ;;  %324 = vst.msk [vmem:[%s498_s25 + $0x38] sm:$0xff] %vm316_vm0, %v291_v44  ;;  %v263_v52 = vadd.f32 %v475_v1, %v224_v45  ;;  %v264_v53 = vadd.f32 %v475_v1, %v225_v46  ;;  %v201_v33 = vld [vmem:[%s470_s20 + $0xd8] sm:$0xff]  ;;  %v202_v34 = vld [vmem:[%s470_s20 + $0xe0] sm:$0xff] }
  0x1b   : > { %v265_v54 = vadd.f32 %v475_v1, %v226_v47  ;;  %v228_v55 = vmul.f32 %v465_v0, %v189_v43  ;;  %v292_v59 = vmax.f32 %v260_v48, 0.0  ;;  %v293_v60 = vmax.f32 %v261_v49, 0.0  ;;  %v203_v35 = vld [vmem:[%s470_s20 + $0xe8] sm:$0xff]  ;;  %v204_v40 = vld [vmem:[%s470_s20 + $0xf0] sm:$0xff]  ;;  %v205_v45 = vld [vmem:[%s470_s20 + $0xf8] sm:$0xff] }
  0x1c   : > { %v294_v61 = vmax.f32 %v262_v50, 0.0  ;;  %v266_v62 = vadd.f32 %v475_v1, %v227_v51  ;;  %v295_v4 = vmax.f32 %v263_v52, 0.0  ;;  %v296_v5 = vmax.f32 %v264_v53, 0.0 }
  0x1d   : > { %v297_v6 = vmax.f32 %v265_v54, 0.0  ;;  %v267_v7 = vadd.f32 %v475_v1, %v228_v55  ;;  %325 = vst.msk [vmem:[%s498_s25 + $0x40] sm:$0xff] %vm316_vm0, %v292_v59  ;;  %326 = vst.msk [vmem:[%s498_s25 + $0x48] sm:$0xff] %vm316_vm0, %v293_v60  ;;  %v229_v10 = vmul.f32 %v465_v0, %v190_v56  ;;  %v230_v11 = vmul.f32 %v465_v0, %v191_v57 }
  0x1e   : > { %327 = vst.msk [vmem:[%s498_s25 + $0x50] sm:$0xff] %vm316_vm0, %v294_v61  ;;  %v298_v9 = vmax.f32 %v266_v62, 0.0  ;;  %v231_v12 = vmul.f32 %v465_v0, %v192_v58  ;;  %328 = vst.msk [vmem:[%s498_s25 + $0x58] sm:$0xff] %vm316_vm0, %v295_v4  ;;  %v232_v15 = vmul.f32 %v465_v0, %v193_v63  ;;  %v233_v16 = vmul.f32 %v465_v0, %v194_v2 }
  0x1f   : > { %329 = vst.msk [vmem:[%s498_s25 + $0x60] sm:$0xff] %vm316_vm0, %v296_v5  ;;  %330 = vst.msk [vmem:[%s498_s25 + $0x68] sm:$0xff] %vm316_vm0, %v297_v6  ;;  %v299_v14 = vmax.f32 %v267_v7, 0.0  ;;  %v234_v17 = vmul.f32 %v465_v0, %v195_v3  ;;  %v268_v18 = vadd.f32 %v475_v1, %v229_v10  ;;  %v269_v19 = vadd.f32 %v475_v1, %v230_v11 }
  0x20   : > { %331 = vst.msk [vmem:[%s498_s25 + $0x70] sm:$0xff] %vm316_vm0, %v298_v9  ;;  %v270_v20 = vadd.f32 %v475_v1, %v231_v12  ;;  %v235_v21 = vmul.f32 %v465_v0, %v196_v8  ;;  %v271_v22 = vadd.f32 %v475_v1, %v232_v15  ;;  %v272_v23 = vadd.f32 %v475_v1, %v233_v16 }
  0x21   : > { %332 = vst.msk [vmem:[%s498_s25 + $0x78] sm:$0xff] %vm316_vm0, %v299_v14  ;;  %v273_v24 = vadd.f32 %v475_v1, %v234_v17  ;;  %v236_v25 = vmul.f32 %v465_v0, %v197_v13  ;;  %v300_v29 = vmax.f32 %v268_v18, 0.0  ;;  %v301_v30 = vmax.f32 %v269_v19, 0.0 }
  0x22   : > { %v302_v31 = vmax.f32 %v270_v20, 0.0  ;;  %v274_v32 = vadd.f32 %v475_v1, %v235_v21  ;;  %v303_v36 = vmax.f32 %v271_v22, 0.0  ;;  %v304_v37 = vmax.f32 %v272_v23, 0.0 }
  0x23   : > { %v305_v38 = vmax.f32 %v273_v24, 0.0  ;;  %v275_v39 = vadd.f32 %v475_v1, %v236_v25  ;;  %333 = vst.msk [vmem:[%s498_s25 + $0x80] sm:$0xff] %vm316_vm0, %v300_v29  ;;  %334 = vst.msk [vmem:[%s498_s25 + $0x88] sm:$0xff] %vm316_vm0, %v301_v30  ;;  %v237_v42 = vmul.f32 %v465_v0, %v198_v26  ;;  %v238_v43 = vmul.f32 %v465_v0, %v199_v27 }
  0x24   : > { %335 = vst.msk [vmem:[%s498_s25 + $0x90] sm:$0xff] %vm316_vm0, %v302_v31  ;;  %v306_v41 = vmax.f32 %v274_v32, 0.0  ;;  %v239_v44 = vmul.f32 %v465_v0, %v200_v28  ;;  %336 = vst.msk [vmem:[%s498_s25 + $0x98] sm:$0xff] %vm316_vm0, %v303_v36  ;;  %v240_v47 = vmul.f32 %v465_v0, %v201_v33  ;;  %v241_v48 = vmul.f32 %v465_v0, %v202_v34 }
  0x25   : > { %337 = vst.msk [vmem:[%s498_s25 + $0xa0] sm:$0xff] %vm316_vm0, %v304_v37  ;;  %338 = vst.msk [vmem:[%s498_s25 + $0xa8] sm:$0xff] %vm316_vm0, %v305_v38  ;;  %v307_v46 = vmax.f32 %v275_v39, 0.0  ;;  %v242_v49 = vmul.f32 %v465_v0, %v203_v35  ;;  %v276_v50 = vadd.f32 %v475_v1, %v237_v42  ;;  %v277_v51 = vadd.f32 %v475_v1, %v238_v43 }
  0x26   : > { %339 = vst.msk [vmem:[%s498_s25 + $0xb0] sm:$0xff] %vm316_vm0, %v306_v41  ;;  %v278_v52 = vadd.f32 %v475_v1, %v239_v44  ;;  %v243_v53 = vmul.f32 %v465_v0, %v204_v40  ;;  %v279_v54 = vadd.f32 %v475_v1, %v240_v47  ;;  %v280_v55 = vadd.f32 %v475_v1, %v241_v48 }
  0x27   : > { %340 = vst.msk [vmem:[%s498_s25 + $0xb8] sm:$0xff] %vm316_vm0, %v307_v46  ;;  %v281_v56 = vadd.f32 %v475_v1, %v242_v49  ;;  %v244_v57 = vmul.f32 %v465_v0, %v205_v45  ;;  %v308_v58 = vmax.f32 %v276_v50, 0.0  ;;  %v309_v59 = vmax.f32 %v277_v51, 0.0 }
  0x28   : > { %v310_v60 = vmax.f32 %v278_v52, 0.0  ;;  %v282_v61 = vadd.f32 %v475_v1, %v243_v53  ;;  %v311_v62 = vmax.f32 %v279_v54, 0.0  ;;  %v312_v63 = vmax.f32 %v280_v55, 0.0 }
  0x29   : > { %v313_v2 = vmax.f32 %v281_v56, 0.0  ;;  %v283_v3 = vadd.f32 %v475_v1, %v244_v57  ;;  %341 = vst.msk [vmem:[%s498_s25 + $0xc0] sm:$0xff] %vm316_vm0, %v308_v58  ;;  %342 = vst.msk [vmem:[%s498_s25 + $0xc8] sm:$0xff] %vm316_vm0, %v309_v59 }
  0x2a   : > { %343 = vst.msk [vmem:[%s498_s25 + $0xd0] sm:$0xff] %vm316_vm0, %v310_v60  ;;  %v314_v4 = vmax.f32 %v282_v61, 0.0  ;;  %344 = vst.msk [vmem:[%s498_s25 + $0xd8] sm:$0xff] %vm316_vm0, %v311_v62 }
  0x2b   : > { %345 = vst.msk [vmem:[%s498_s25 + $0xe0] sm:$0xff] %vm316_vm0, %v312_v63  ;;  %346 = vst.msk [vmem:[%s498_s25 + $0xe8] sm:$0xff] %vm316_vm0, %v313_v2  ;;  %v315_v0 = vmax.f32 %v283_v3, 0.0 }
  0x2c   : > { %347 = vst.msk [vmem:[%s498_s25 + $0xf0] sm:$0xff] %vm316_vm0, %v314_v4 }
  0x2d   : > { %348 = vst.msk [vmem:[%s498_s25 + $0xf8] sm:$0xff] %vm316_vm0, %v315_v0 }
  0x2e PF: > { %s13_s12 = sadd.s32 1, %s432_s12  }
  0x2f   : > { %p10_p4 = scmp.ge.s32.totalorder %s13_s12, 4  }
  0x31   :  { %12 = sbr.rel (!%p10_p4) target bundleno = 1 (0x1), region = 62 }

// kernel: rrcnn_block.11
= control target key start
LH: loop header
LB: loop body
LE: loop exit
PB: predicated region body
PF: predicated region fallthrough
CT: control target
= control target key end

     0   :  { %s586_s15 = smov 0   ;;  %s819_s0 = inlined_call_operand.vmem [shape: f32[512,8], index: 0, kind: input, shape index: {}]   ;;  %s820_s1 = inlined_call_operand.vmem [shape: f32[1,8], index: 1, kind: input, shape index: {}]   ;;  %s821_s2 = inlined_call_operand.vmem [shape: f32[1,8], index: 2, kind: input, shape index: {}]   ;;  %s822_s3 = inlined_call_operand.vmem [shape: f32[512,8], index: 3, kind: input, shape index: {}]   ;;  %s823_s4 = inlined_call_operand.vmem [shape: f32[512,8], index: 4, kind: output, shape index: {}]  }
   0x1 LB: > { %s530_s16 = sadd.s32 4294967295, %s559_s15   ;;  %p534_p0 = scmp.ge.s32.totalorder %s559_s15, 1  ;;  %s559_s15 = sphi %s586_s15, %s14_s15  }
   0x2   : > { %p174_p1 = scmp.lt.s32.totalorder %s559_s15, 3 }
   0x4   : > { %p175_p2 = pnand %p534_p0, %p174_p1 }
   0x5   : > { %s535_s17 = sshll.u32 (!%p175_p2), %s530_s16, 5  ;;  %v599_v0 = vld [vmem:[%s820_s1] ss:$0 sm:$0xff] (!%p175_p2)  ;;  %vm429_vm0 = vcmask (!%p175_p2), 64512  }
   0x6   : > { %178 = sbr.rel (%p175_p2) target bundleno = 54 (0x36), region = 36  ;;  %p206_p3 = scmp.lt.s32.totalorder (!%p175_p2), %s535_s17, 63  ;;  %v617_v2 = vld [vmem:[%s821_s2] ss:$0 sm:$0xff] (!%p175_p2) }
   0xd   : > { %s825_s17 = smov (!%p206_p3, %s535_s17), 63 }
   0xe   : > { %s594_s18 = sshll.u32 %s825_s17, 3 }
   0xf   : > { %s605_s23 = scalar_lea.vmem %s819_s0, %s594_s18  ;;  %s611_s26 = scalar_lea.vmem %s822_s3, %s594_s18 }
  0x10   : > { %v223_v1 = vld [vmem:[%s605_s23] sm:$0xff]  ;;  %v224_v3 = vld [vmem:[%s605_s23 + $0x8] sm:$0xff]  ;;  %v225_v6 = vld [vmem:[%s605_s23 + $0x10] sm:$0xff]  ;;  %s645_s5 = scalar_lea.vmem %s823_s4, %s594_s18 }
  0x11   : > { %v262_v4 = vmul.f32 %v599_v0, %v223_v1  ;;  %v263_v5 = vmul.f32 %v599_v0, %v224_v3  ;;  %v264_v7 = vmul.f32 %v599_v0, %v225_v6  ;;  %v226_v8 = vld [vmem:[%s605_s23 + $0x18] sm:$0xff]  ;;  %v227_v9 = vld [vmem:[%s605_s23 + $0x20] sm:$0xff]  ;;  %v228_v15 = vld [vmem:[%s605_s23 + $0x28] sm:$0xff] }
  0x12   : > { %v333_v11 = vld [vmem:[%s611_s26] sm:$0xff]  ;;  %v265_v13 = vmul.f32 %v599_v0, %v226_v8  ;;  %v266_v14 = vmul.f32 %v599_v0, %v227_v9  ;;  %v334_v16 = vld [vmem:[%s611_s26 + $0x8] sm:$0xff]  ;;  %v267_v18 = vmul.f32 %v599_v0, %v228_v15  ;;  %v229_v19 = vld [vmem:[%s605_s23 + $0x30] sm:$0xff] }
  0x13   : > { %v301_v10 = vadd.f32 %v617_v2, %v262_v4  ;;  %v302_v12 = vadd.f32 %v617_v2, %v263_v5  ;;  %v303_v17 = vadd.f32 %v617_v2, %v264_v7  ;;  %v230_v20 = vld [vmem:[%s605_s23 + $0x38] sm:$0xff]  ;;  %v335_v23 = vld [vmem:[%s611_s26 + $0x10] sm:$0xff]  ;;  %v337_v28 = vld [vmem:[%s611_s26 + $0x20] sm:$0xff]  ;;  %v268_v30 = vmul.f32 %v599_v0, %v229_v19 }
  0x14   : > { %v304_v24 = vadd.f32 %v617_v2, %v265_v13  ;;  %v336_v25 = vld [vmem:[%s611_s26 + $0x18] sm:$0xff]  ;;  %v305_v26 = vadd.f32 %v617_v2, %v266_v14  ;;  %v306_v29 = vadd.f32 %v617_v2, %v267_v18  ;;  %v269_v31 = vmul.f32 %v599_v0, %v230_v20  ;;  %v231_v32 = vld [vmem:[%s605_s23 + $0x40] sm:$0xff]  ;;  %v232_v33 = vld [vmem:[%s605_s23 + $0x48] sm:$0xff] }
  0x15   : > { %v365_v21 = vmax.f32 %v301_v10, 0.0  ;;  %v366_v22 = vmax.f32 %v302_v12, 0.0  ;;  %v367_v27 = vmax.f32 %v303_v17, 0.0  ;;  %v338_v38 = vld [vmem:[%s611_s26 + $0x28] sm:$0xff]  ;;  %v233_v39 = vld [vmem:[%s605_s23 + $0x50] sm:$0xff]  ;;  %v307_v42 = vadd.f32 %v617_v2, %v268_v30  ;;  %v234_v44 = vld [vmem:[%s605_s23 + $0x58] sm:$0xff] }
  0x16   : > { %v368_v36 = vmax.f32 %v304_v24, 0.0  ;;  %v369_v37 = vmax.f32 %v305_v26, 0.0  ;;  %v370_v41 = vmax.f32 %v306_v29, 0.0  ;;  %v308_v43 = vadd.f32 %v617_v2, %v269_v31  ;;  %v235_v45 = vld [vmem:[%s605_s23 + $0x60] sm:$0xff]  ;;  %v339_v48 = vld [vmem:[%s611_s26 + $0x30] sm:$0xff]  ;;  %v340_v49 = vld [vmem:[%s611_s26 + $0x38] sm:$0xff] }
  0x17   : > { %v397_v34 = vadd.f32 %v365_v21, %v333_v11  ;;  %v398_v35 = vadd.f32 %v366_v22, %v334_v16  ;;  %v399_v40 = vadd.f32 %v367_v27, %v335_v23  ;;  %v270_v50 = vmul.f32 %v599_v0, %v231_v32  ;;  %v236_v52 = vld [vmem:[%s605_s23 + $0x68] sm:$0xff]  ;;  %v237_v61 = vld [vmem:[%s605_s23 + $0x70] sm:$0xff]  ;;  %v238_v62 = vld [vmem:[%s605_s23 + $0x78] sm:$0xff] }
  0x18   : > { %v400_v46 = vadd.f32 %v368_v36, %v336_v25  ;;  %v401_v47 = vadd.f32 %v369_v37, %v337_v28  ;;  %v271_v51 = vmul.f32 %v599_v0, %v232_v33  ;;  %v402_v53 = vadd.f32 %v370_v41, %v338_v38  ;;  %v341_v3 = vld [vmem:[%s611_s26 + $0x40] sm:$0xff]  ;;  %v342_v4 = vld [vmem:[%s611_s26 + $0x48] sm:$0xff]  ;;  %v343_v9 = vld [vmem:[%s611_s26 + $0x50] sm:$0xff] }
  0x19   : > { %430 = vst.msk [vmem:[%s645_s5] sm:$0xff] %vm429_vm0, %v397_v34  ;;  %431 = vst.msk [vmem:[%s645_s5 + $0x8] sm:$0xff] %vm429_vm0, %v398_v35  ;;  %v371_v54 = vmax.f32 %v307_v42, 0.0  ;;  %v372_v55 = vmax.f32 %v308_v43, 0.0  ;;  %v272_v56 = vmul.f32 %v599_v0, %v233_v39  ;;  %v309_v57 = vadd.f32 %v617_v2, %v270_v50  ;;  %v344_v11 = vld [vmem:[%s611_s26 + $0x58] sm:$0xff]  ;;  %v345_v14 = vld [vmem:[%s611_s26 + $0x60] sm:$0xff] }
  0x1a   : > { %432 = vst.msk [vmem:[%s645_s5 + $0x10] sm:$0xff] %vm429_vm0, %v399_v40  ;;  %433 = vst.msk [vmem:[%s645_s5 + $0x18] sm:$0xff] %vm429_vm0, %v400_v46  ;;  %v310_v58 = vadd.f32 %v617_v2, %v271_v51  ;;  %v273_v59 = vmul.f32 %v599_v0, %v234_v44  ;;  %v274_v60 = vmul.f32 %v599_v0, %v235_v45  ;;  %v239_v18 = vld [vmem:[%s605_s23 + $0x80] sm:$0xff]  ;;  %v240_v19 = vld [vmem:[%s605_s23 + $0x88] sm:$0xff] }
  0x1b   : > { %434 = vst.msk [vmem:[%s645_s5 + $0x20] sm:$0xff] %vm429_vm0, %v401_v47  ;;  %435 = vst.msk [vmem:[%s645_s5 + $0x28] sm:$0xff] %vm429_vm0, %v402_v53  ;;  %v403_v63 = vadd.f32 %v371_v54, %v339_v48  ;;  %v404_v1 = vadd.f32 %v372_v55, %v340_v49  ;;  %v311_v5 = vadd.f32 %v617_v2, %v272_v56  ;;  %v373_v7 = vmax.f32 %v309_v57, 0.0  ;;  %v346_v24 = vld [vmem:[%s611_s26 + $0x68] sm:$0xff]  ;;  %v241_v25 = vld [vmem:[%s605_s23 + $0x90] sm:$0xff] }
  0x1c   : > { %v275_v6 = vmul.f32 %v599_v0, %v236_v52  ;;  %v374_v8 = vmax.f32 %v310_v58, 0.0  ;;  %v312_v10 = vadd.f32 %v617_v2, %v273_v59  ;;  %v313_v12 = vadd.f32 %v617_v2, %v274_v60  ;;  %v242_v30 = vld [vmem:[%s605_s23 + $0x98] sm:$0xff]  ;;  %v243_v31 = vld [vmem:[%s605_s23 + $0xa0] sm:$0xff]  ;;  %v347_v34 = vld [vmem:[%s611_s26 + $0x70] sm:$0xff] }
  0x1d   : > { %436 = vst.msk [vmem:[%s645_s5 + $0x30] sm:$0xff] %vm429_vm0, %v403_v63  ;;  %437 = vst.msk [vmem:[%s645_s5 + $0x38] sm:$0xff] %vm429_vm0, %v404_v1  ;;  %v375_v13 = vmax.f32 %v311_v5, 0.0  ;;  %v276_v16 = vmul.f32 %v599_v0, %v237_v61  ;;  %v277_v17 = vmul.f32 %v599_v0, %v238_v62  ;;  %v405_v20 = vadd.f32 %v373_v7, %v341_v3  ;;  %v348_v35 = vld [vmem:[%s611_s26 + $0x78] sm:$0xff]  ;;  %v244_v38 = vld [vmem:[%s605_s23 + $0xa8] sm:$0xff] }
  0x1e   : > { %v314_v15 = vadd.f32 %v617_v2, %v275_v6  ;;  %v406_v21 = vadd.f32 %v374_v8, %v342_v4  ;;  %v376_v22 = vmax.f32 %v312_v10, 0.0  ;;  %v377_v23 = vmax.f32 %v313_v12, 0.0  ;;  %v245_v47 = vld [vmem:[%s605_s23 + $0xb0] sm:$0xff]  ;;  %v246_v48 = vld [vmem:[%s605_s23 + $0xb8] sm:$0xff]  ;;  %v349_v51 = vld [vmem:[%s611_s26 + $0x80] sm:$0xff] }
  0x1f   : > { %v407_v26 = vadd.f32 %v375_v13, %v343_v9  ;;  %v315_v28 = vadd.f32 %v617_v2, %v276_v16  ;;  %v316_v29 = vadd.f32 %v617_v2, %v277_v17  ;;  %438 = vst.msk [vmem:[%s645_s5 + $0x40] sm:$0xff] %vm429_vm0, %v405_v20  ;;  %v278_v36 = vmul.f32 %v599_v0, %v239_v18  ;;  %v350_v52 = vld [vmem:[%s611_s26 + $0x88] sm:$0xff]  ;;  %v351_v57 = vld [vmem:[%s611_s26 + $0x90] sm:$0xff]  ;;  %v352_v59 = vld [vmem:[%s611_s26 + $0x98] sm:$0xff] }
  0x20   : > { %v378_v27 = vmax.f32 %v314_v15, 0.0  ;;  %439 = vst.msk [vmem:[%s645_s5 + $0x48] sm:$0xff] %vm429_vm0, %v406_v21  ;;  %v408_v32 = vadd.f32 %v376_v22, %v344_v11  ;;  %v409_v33 = vadd.f32 %v377_v23, %v345_v14  ;;  %v279_v37 = vmul.f32 %v599_v0, %v240_v19  ;;  %v353_v62 = vld [vmem:[%s611_s26 + $0xa0] sm:$0xff]  ;;  %v248_v5 = vld [vmem:[%s605_s23 + $0xc8] sm:$0xff]  ;;  %v249_v11 = vld [vmem:[%s605_s23 + $0xd0] sm:$0xff] }
  0x21   : > { %440 = vst.msk [vmem:[%s645_s5 + $0x50] sm:$0xff] %vm429_vm0, %v407_v26  ;;  %v379_v40 = vmax.f32 %v315_v28, 0.0  ;;  %v380_v41 = vmax.f32 %v316_v29, 0.0  ;;  %v280_v42 = vmul.f32 %v599_v0, %v241_v25  ;;  %v317_v43 = vadd.f32 %v617_v2, %v278_v36  ;;  %v247_v4 = vld [vmem:[%s605_s23 + $0xc0] sm:$0xff]  ;;  %v354_v10 = vld [vmem:[%s611_s26 + $0xa8] sm:$0xff]  ;;  %v250_v16 = vld [vmem:[%s605_s23 + $0xd8] sm:$0xff] }
  0x22   : > { %v410_v39 = vadd.f32 %v378_v27, %v346_v24  ;;  %441 = vst.msk [vmem:[%s645_s5 + $0x58] sm:$0xff] %vm429_vm0, %v408_v32  ;;  %442 = vst.msk [vmem:[%s645_s5 + $0x60] sm:$0xff] %vm429_vm0, %v409_v33  ;;  %v318_v44 = vadd.f32 %v617_v2, %v279_v37  ;;  %v281_v45 = vmul.f32 %v599_v0, %v242_v30  ;;  %v251_v17 = vld [vmem:[%s605_s23 + $0xe0] sm:$0xff]  ;;  %v355_v20 = vld [vmem:[%s611_s26 + $0xb0] sm:$0xff] }
  0x23   : > { %v282_v46 = vmul.f32 %v599_v0, %v243_v31  ;;  %v411_v49 = vadd.f32 %v379_v40, %v347_v34  ;;  %v412_v50 = vadd.f32 %v380_v41, %v348_v35  ;;  %v319_v53 = vadd.f32 %v617_v2, %v280_v42  ;;  %v356_v21 = vld [vmem:[%s611_s26 + $0xb8] sm:$0xff]  ;;  %v252_v24 = vld [vmem:[%s605_s23 + $0xe8] sm:$0xff]  ;;  %v253_v33 = vld [vmem:[%s605_s23 + $0xf0] sm:$0xff] }
  0x24   : > { %443 = vst.msk [vmem:[%s645_s5 + $0x68] sm:$0xff] %vm429_vm0, %v410_v39  ;;  %v283_v54 = vmul.f32 %v599_v0, %v244_v38  ;;  %v381_v55 = vmax.f32 %v317_v43, 0.0  ;;  %v382_v56 = vmax.f32 %v318_v44, 0.0  ;;  %v320_v58 = vadd.f32 %v617_v2, %v281_v45  ;;  %v254_v34 = vld [vmem:[%s605_s23 + $0xf8] sm:$0xff]  ;;  %v357_v37 = vld [vmem:[%s611_s26 + $0xc0] sm:$0xff]  ;;  %v358_v38 = vld [vmem:[%s611_s26 + $0xc8] sm:$0xff] }
  0x25   : > { %v321_v60 = vadd.f32 %v617_v2, %v282_v46  ;;  %444 = vst.msk [vmem:[%s645_s5 + $0x70] sm:$0xff] %vm429_vm0, %v411_v49  ;;  %445 = vst.msk [vmem:[%s645_s5 + $0x78] sm:$0xff] %vm429_vm0, %v412_v50  ;;  %v383_v61 = vmax.f32 %v319_v53, 0.0  ;;  %v284_v1 = vmul.f32 %v599_v0, %v245_v47  ;;  %v285_v3 = vmul.f32 %v599_v0, %v246_v48  ;;  %v359_v43 = vld [vmem:[%s611_s26 + $0xd0] sm:$0xff]  ;;  %v360_v47 = vld [vmem:[%s611_s26 + $0xd8] sm:$0xff] }
  0x26   : > { %v322_v63 = vadd.f32 %v617_v2, %v283_v54  ;;  %v413_v6 = vadd.f32 %v381_v55, %v349_v51  ;;  %v414_v7 = vadd.f32 %v382_v56, %v350_v52  ;;  %v384_v8 = vmax.f32 %v320_v58, 0.0  ;;  %v361_v48 = vld [vmem:[%s611_s26 + $0xe0] sm:$0xff]  ;;  %v362_v56 = vld [vmem:[%s611_s26 + $0xe8] sm:$0xff] }
  0x27   : > { %v385_v9 = vmax.f32 %v321_v60, 0.0  ;;  %v415_v12 = vadd.f32 %v383_v61, %v351_v57  ;;  %v323_v14 = vadd.f32 %v617_v2, %v284_v1  ;;  %v324_v15 = vadd.f32 %v617_v2, %v285_v3 }
  0x28   : > { %v386_v13 = vmax.f32 %v322_v63, 0.0  ;;  %446 = vst.msk [vmem:[%s645_s5 + $0x80] sm:$0xff] %vm429_vm0, %v413_v6  ;;  %447 = vst.msk [vmem:[%s645_s5 + $0x88] sm:$0xff] %vm429_vm0, %v414_v7  ;;  %v416_v18 = vadd.f32 %v384_v8, %v352_v59  ;;  %v286_v22 = vmul.f32 %v599_v0, %v247_v4  ;;  %v287_v23 = vmul.f32 %v599_v0, %v248_v5  ;;  %v364_v63 = vld [vmem:[%s611_s26 + $0xf8] sm:$0xff] }
  0x29   : > { %v417_v19 = vadd.f32 %v385_v9, %v353_v62  ;;  %448 = vst.msk [vmem:[%s645_s5 + $0x90] sm:$0xff] %vm429_vm0, %v415_v12  ;;  %v387_v26 = vmax.f32 %v323_v14, 0.0  ;;  %v388_v27 = vmax.f32 %v324_v15, 0.0  ;;  %v288_v28 = vmul.f32 %v599_v0, %v249_v11  ;;  %v363_v62 = vld [vmem:[%s611_s26 + $0xf0] sm:$0xff] }
  0x2a   : > { %v418_v25 = vadd.f32 %v386_v13, %v354_v10  ;;  %449 = vst.msk [vmem:[%s645_s5 + $0x98] sm:$0xff] %vm429_vm0, %v416_v18  ;;  %v325_v29 = vadd.f32 %v617_v2, %v286_v22  ;;  %v326_v30 = vadd.f32 %v617_v2, %v287_v23  ;;  %v289_v31 = vmul.f32 %v599_v0, %v250_v16 }
  0x2b   : > { %450 = vst.msk [vmem:[%s645_s5 + $0xa0] sm:$0xff] %vm429_vm0, %v417_v19  ;;  %v290_v32 = vmul.f32 %v599_v0, %v251_v17  ;;  %v419_v35 = vadd.f32 %v387_v26, %v355_v20  ;;  %v420_v36 = vadd.f32 %v388_v27, %v356_v21  ;;  %v327_v39 = vadd.f32 %v617_v2, %v288_v28 }
  0x2c   : > { %451 = vst.msk [vmem:[%s645_s5 + $0xa8] sm:$0xff] %vm429_vm0, %v418_v25  ;;  %v291_v40 = vmul.f32 %v599_v0, %v252_v24  ;;  %v389_v41 = vmax.f32 %v325_v29, 0.0  ;;  %v390_v42 = vmax.f32 %v326_v30, 0.0  ;;  %v328_v44 = vadd.f32 %v617_v2, %v289_v31 }
  0x2d   : > { %v329_v45 = vadd.f32 %v617_v2, %v290_v32  ;;  %452 = vst.msk [vmem:[%s645_s5 + $0xb0] sm:$0xff] %vm429_vm0, %v419_v35  ;;  %453 = vst.msk [vmem:[%s645_s5 + $0xb8] sm:$0xff] %vm429_vm0, %v420_v36  ;;  %v391_v46 = vmax.f32 %v327_v39, 0.0  ;;  %v292_v50 = vmul.f32 %v599_v0, %v253_v33  ;;  %v293_v51 = vmul.f32 %v599_v0, %v254_v34 }
  0x2e   : > { %v330_v49 = vadd.f32 %v617_v2, %v291_v40  ;;  %v421_v52 = vadd.f32 %v389_v41, %v357_v37  ;;  %v422_v53 = vadd.f32 %v390_v42, %v358_v38  ;;  %v392_v54 = vmax.f32 %v328_v44, 0.0 }
  0x2f   : > { %v393_v55 = vmax.f32 %v329_v45, 0.0  ;;  %v423_v57 = vadd.f32 %v391_v46, %v359_v43  ;;  %v331_v59 = vadd.f32 %v617_v2, %v292_v50  ;;  %v332_v60 = vadd.f32 %v617_v2, %v293_v51 }
  0x30   : > { %v394_v58 = vmax.f32 %v330_v49, 0.0  ;;  %454 = vst.msk [vmem:[%s645_s5 + $0xc0] sm:$0xff] %vm429_vm0, %v421_v52  ;;  %455 = vst.msk [vmem:[%s645_s5 + $0xc8] sm:$0xff] %vm429_vm0, %v422_v53  ;;  %v424_v0 = vadd.f32 %v392_v54, %v360_v47 }
  0x31   : > { %v425_v61 = vadd.f32 %v393_v55, %v361_v48  ;;  %456 = vst.msk [vmem:[%s645_s5 + $0xd0] sm:$0xff] %vm429_vm0, %v423_v57  ;;  %v395_v3 = vmax.f32 %v331_v59, 0.0  ;;  %v396_v4 = vmax.f32 %v332_v60, 0.0 }
  0x32   : > { %v426_v1 = vadd.f32 %v394_v58, %v362_v56  ;;  %457 = vst.msk [vmem:[%s645_s5 + $0xd8] sm:$0xff] %vm429_vm0, %v424_v0 }
  0x33   : > { %458 = vst.msk [vmem:[%s645_s5 + $0xe0] sm:$0xff] %vm429_vm0, %v425_v61  ;;  %v427_v2 = vadd.f32 %v395_v3, %v363_v62  ;;  %v428_v5 = vadd.f32 %v396_v4, %v364_v63 }
  0x34   : > { %459 = vst.msk [vmem:[%s645_s5 + $0xe8] sm:$0xff] %vm429_vm0, %v426_v1 }
  0x35   : > { %460 = vst.msk [vmem:[%s645_s5 + $0xf0] sm:$0xff] %vm429_vm0, %v427_v2  ;;  %461 = vst.msk [vmem:[%s645_s5 + $0xf8] sm:$0xff] %vm429_vm0, %v428_v5 }
  0x36 PF: > { %s14_s15 = sadd.s32 1, %s559_s15  }
  0x37   : > { %p11_p4 = scmp.ge.s32.totalorder %s14_s15, 4  }
  0x39   :  { %13 = sbr.rel (!%p11_p4) target bundleno = 1 (0x1), region = 69 }

// kernel: rrcnn_block.10
= control target key start
LH: loop header
LB: loop body
LE: loop exit
PB: predicated region body
PF: predicated region fallthrough
CT: control target
= control target key end

     0   :  { %s4166_s15 = smov 0   ;;  %s4920_s0 = inlined_call_operand.vmem [shape: f32[2,16,16,8], index: 0, kind: input, shape index: {}]   ;;  %s4921_s1 = inlined_call_operand.vmem [shape: bf16[9,8,8], index: 1, kind: input, shape index: {}]   ;;  %s4922_s2 = inlined_call_operand.vmem [shape: f32[512,8], index: 2, kind: output, shape index: {0}]   ;;  %s4923_s3 = inlined_call_operand.vmem [shape: f32[2,1,8], index: 3, kind: output, shape index: {1}]   ;;  %s4924_s4 = inlined_call_operand.vmem [shape: f32[2,1,8], index: 4, kind: output, shape index: {2}]  }
   0x1 LB: > { %s4172_s16 = sadd.s32 4294967295, %s4138_s15   ;;  %p3236_p0 = scmp.ge.s32.totalorder %s4138_s15, 1  ;;  %s4138_s15 = sphi %s4166_s15, %s15_s15  }
   0x2   : > { %p167_p1 = scmp.lt.s32.totalorder %s4138_s15, 3 }
   0x4   : > { %p168_p2 = pnand %p3236_p0, %p167_p1 }
   0x5   : > { %v3241_v0 = vld [vmem:[%s4921_s1 + $0x4] sm:$0xf] (!%p168_p2)  ;;  %vm485_vm0 = vcmask (!%p168_p2), 1043456   ;;  %v4182_v1 = vld [vmem:[%s4921_s1 + $0x10] sm:$0xf] (!%p168_p2)  ;;  %vm217_vm1 = vcmask (!%p168_p2), 64512  }
   0x6   : > { %171 = sbr.rel (%p168_p2) target bundleno = 564 (0x234), region = 28  ;;  %4113 = vmatprep.subr.msk.bf16.mxu1 (!%p168_p2), %vm485_vm0, %v3241_v0  ;;  %4117 = vmatprep.subr.msk.bf16.mxu0 (!%p168_p2), %vm485_vm0, %v4182_v1  ;;  %v487_v2 = vsel (!%p168_p2), %vm485_vm0, %v3241_v0, 0  ;;  %v4190_v3 = vsel (!%p168_p2), %vm485_vm0, %v4182_v1, 0  ;;  %vm220_vm2 = vcmask (!%p168_p2), 58368   ;;  %p199_p3 = scmp.lt.s32.totalorder (!%p168_p2), %s4172_s16, 1  ;;  %v4140_v4 = vmov (!%p168_p2), 0.0  }
   0x7   : > { %3550 = vmatpush3.bf16.msra.mxu1 (!%p168_p2), %v487_v2  ;;  %3686 = vmatpush3.bf16.msra.mxu0 (!%p168_p2), %v4190_v3  ;;  %218 = vst.msk [vmem:[#allocation2] sm:$0xff] (!%p168_p2), %vm217_vm1, %v4140_v4  ;;  %219 = vst.msk [vmem:[#allocation2 + $0x8] sm:$0xff] (!%p168_p2), %vm217_vm1, %v4140_v4  ;;  %v386_v5 = vld [vmem:[%s4921_s1] sm:$0xf] (!%p168_p2)  ;;  %v4254_v6 = vld [vmem:[%s4921_s1 + $0x14] sm:$0xf] (!%p168_p2) }
   0x8   : > { %221 = vst.msk [vmem:[#allocation2 + $0x10] sm:$0x3] (!%p168_p2), %vm220_vm2, %v4140_v4  ;;  %224 = vst.msk [vmem:[#allocation2 + $0x28] sm:$0x3] (!%p168_p2), %vm220_vm2, %v4140_v4  ;;  %4114 = vmatprep.subr.msk.bf16.mxu1 (!%p168_p2), %vm485_vm0, %v386_v5  ;;  %4119 = vmatprep.subr.msk.bf16.mxu0 (!%p168_p2), %vm485_vm0, %v4254_v6  ;;  %v699_v36 = vsel (!%p168_p2), %vm485_vm0, %v386_v5, 0  ;;  %v1843_v41 = vsel (!%p168_p2), %vm485_vm0, %v4254_v6, 0 }
   0x9   : > { %222 = vst.msk [vmem:[#allocation2 + $0x18] sm:$0xff] (!%p168_p2), %vm217_vm1, %v4140_v4  ;;  %223 = vst.msk [vmem:[#allocation2 + $0x20] sm:$0xff] (!%p168_p2), %vm217_vm1, %v4140_v4  ;;  %v4327_v43 = vld [vmem:[%s4921_s1 + $0x18] sm:$0xf] (!%p168_p2)  ;;  %v4334_v44 = vld [vmem:[%s4921_s1 + $0x8] sm:$0xf] (!%p168_p2) }
   0xa   : > { %225 = vst.msk [vmem:[#allocation2 + $0x30] sm:$0xff] (!%p168_p2), %vm217_vm1, %v4140_v4  ;;  %226 = vst.msk [vmem:[#allocation2 + $0x38] sm:$0xff] (!%p168_p2), %vm217_vm1, %v4140_v4  ;;  %s3239_s14 = sshll.u32 (!%p168_p2), %s4172_s16, 5  ;;  %vm3022_vm3 = vcmask (!%p168_p2), 57344  }
   0xb   : > { %227 = vst.msk [vmem:[#allocation2 + $0x40] sm:$0x3] (!%p168_p2), %vm220_vm2, %v4140_v4  ;;  %230 = vst.msk [vmem:[#allocation2 + $0x58] sm:$0x3] (!%p168_p2), %vm220_vm2, %v4140_v4  ;;  %p205_p4 = scmp.lt.s32.totalorder (!%p168_p2), %s3239_s14, 63 }
   0xc   : > { %228 = vst.msk [vmem:[#allocation2 + $0x48] sm:$0xff] (!%p168_p2), %vm217_vm1, %v4140_v4  ;;  %229 = vst.msk [vmem:[#allocation2 + $0x50] sm:$0xff] (!%p168_p2), %vm217_vm1, %v4140_v4 }
   0xd   : > { %231 = vst.msk [vmem:[#allocation2 + $0x60] sm:$0xff] %vm217_vm1, %v4140_v4  ;;  %232 = vst.msk [vmem:[#allocation2 + $0x68] sm:$0xff] %vm217_vm1, %v4140_v4  ;;  %s4259_s25 = scalar_select %p199_p3, %s4172_s16, 1 }
   0xe   : > { %233 = vst.msk [vmem:[#allocation2 + $0x70] sm:$0x3] %vm220_vm2, %v4140_v4  ;;  %236 = vst.msk [vmem:[#allocation2 + $0x88] sm:$0x3] %vm220_vm2, %v4140_v4  ;;  %v387_v13 = vld [vmem:[#allocation2 + $0x1] sm:$0xff]  ;;  %s4926_s14 = smov (!%p205_p4, %s3239_s14), 63 }
   0xf   : > { %234 = vst.msk [vmem:[#allocation2 + $0x78] sm:$0xff] %vm217_vm1, %v4140_v4  ;;  %235 = vst.msk [vmem:[#allocation2 + $0x80] sm:$0xff] %vm217_vm1, %v4140_v4  ;;  %s3395_s26 = sshll.u32 %s4259_s25, 8  ;;  %v388_v14 = vld [vmem:[#allocation2 + $0x9] sm:$0xff]  ;;  %s3240_s17 = sshll.u32 %s4926_s14, 3 }
  0x10   : > { %237 = vst.msk [vmem:[#allocation2 + $0x90] sm:$0xff] %vm217_vm1, %v4140_v4  ;;  %238 = vst.msk [vmem:[#allocation2 + $0x98] sm:$0xff] %vm217_vm1, %v4140_v4  ;;  %s4268_s29 = scalar_lea.vmem %s4920_s0, %s3395_s26  ;;  %v419_v16 = vpack.c.bf16 %v388_v14, %v387_v13  ;;  %s4771_s20 = scalar_lea.vmem %s4922_s2, %s3240_s17 }
  0x11   : > { %239 = vst.msk [vmem:[#allocation2 + $0xa0] sm:$0x3] %vm220_vm2, %v4140_v4  ;;  %242 = vst.msk [vmem:[#allocation2 + $0xb8] sm:$0x3] %vm220_vm2, %v4140_v4  ;;  %v273_v7 = vld [vmem:[%s4268_s29] sm:$0xff]  ;;  %v274_v8 = vld [vmem:[%s4268_s29 + $0x8] sm:$0xff]  ;;  %s212_s22 = scalar_lea.vmem %s4923_s3, %s4259_s25  ;;  %s215_s26 = scalar_lea.vmem %s4924_s4, %s4259_s25 }
  0x12   : > { %240 = vst.msk [vmem:[#allocation2 + $0xa8] sm:$0xff] %vm217_vm1, %v4140_v4  ;;  %241 = vst.msk [vmem:[#allocation2 + $0xb0] sm:$0xff] %vm217_vm1, %v4140_v4  ;;  %v275_v9 = vld [vmem:[%s4268_s29 + $0x10] sm:$0xff]  ;;  %v276_v10 = vld [vmem:[%s4268_s29 + $0x18] sm:$0xff]  ;;  %3551 = vmatprep.mubr.msk.bf16.mxu1 %vm217_vm1, %v419_v16 }
  0x13   : > { %243 = vst.msk [vmem:[#allocation2 + $0xc0] sm:$0xff] %vm217_vm1, %v4140_v4  ;;  %244 = vst.msk [vmem:[#allocation2 + $0xc8] sm:$0xff] %vm217_vm1, %v4140_v4  ;;  %v277_v11 = vld [vmem:[%s4268_s29 + $0x20] sm:$0xff]  ;;  %v278_v12 = vld [vmem:[%s4268_s29 + $0x28] sm:$0xff] }
  0x14   : > { %245 = vst.msk [vmem:[#allocation2 + $0xd0] sm:$0x3] %vm220_vm2, %v4140_v4  ;;  %248 = vst.msk [vmem:[#allocation2 + $0xe8] sm:$0x3] %vm220_vm2, %v4140_v4  ;;  %v279_v15 = vld [vmem:[%s4268_s29 + $0x30] sm:$0xff]  ;;  %v280_v17 = vld [vmem:[%s4268_s29 + $0x38] sm:$0xff] }
  0x15   : > { %246 = vst.msk [vmem:[#allocation2 + $0xd8] sm:$0xff] %vm217_vm1, %v4140_v4  ;;  %247 = vst.msk [vmem:[#allocation2 + $0xe0] sm:$0xff] %vm217_vm1, %v4140_v4  ;;  %v281_v18 = vld [vmem:[%s4268_s29 + $0x40] sm:$0xff]  ;;  %v282_v19 = vld [vmem:[%s4268_s29 + $0x48] sm:$0xff] }
  0x16   : > { %249 = vst.msk [vmem:[#allocation2 + $0xf0] sm:$0xff] %vm217_vm1, %v4140_v4  ;;  %250 = vst.msk [vmem:[#allocation2 + $0xf8] sm:$0xff] %vm217_vm1, %v4140_v4  ;;  %v283_v20 = vld [vmem:[%s4268_s29 + $0x50] sm:$0xff]  ;;  %v284_v21 = vld [vmem:[%s4268_s29 + $0x58] sm:$0xff] }
  0x17   : > { %251 = vst.msk [vmem:[#allocation2 + $0x100] sm:$0x3] %vm220_vm2, %v4140_v4  ;;  %254 = vst.msk [vmem:[#allocation2 + $0x118] sm:$0x3] %vm220_vm2, %v4140_v4  ;;  %v285_v22 = vld [vmem:[%s4268_s29 + $0x60] sm:$0xff]  ;;  %v286_v23 = vld [vmem:[%s4268_s29 + $0x68] sm:$0xff] }
  0x18   : > { %252 = vst.msk [vmem:[#allocation2 + $0x108] sm:$0xff] %vm217_vm1, %v4140_v4  ;;  %253 = vst.msk [vmem:[#allocation2 + $0x110] sm:$0xff] %vm217_vm1, %v4140_v4  ;;  %v287_v24 = vld [vmem:[%s4268_s29 + $0x70] sm:$0xff]  ;;  %v288_v25 = vld [vmem:[%s4268_s29 + $0x78] sm:$0xff] }
  0x19   : > { %255 = vst.msk [vmem:[#allocation2 + $0x120] sm:$0xff] %vm217_vm1, %v4140_v4  ;;  %256 = vst.msk [vmem:[#allocation2 + $0x128] sm:$0xff] %vm217_vm1, %v4140_v4  ;;  %v289_v26 = vld [vmem:[%s4268_s29 + $0x80] sm:$0xff]  ;;  %v290_v27 = vld [vmem:[%s4268_s29 + $0x88] sm:$0xff] }
  0x1a   : > { %257 = vst.msk [vmem:[#allocation2 + $0x130] sm:$0x3] %vm220_vm2, %v4140_v4  ;;  %260 = vst.msk [vmem:[#allocation2 + $0x148] sm:$0x3] %vm220_vm2, %v4140_v4  ;;  %v291_v28 = vld [vmem:[%s4268_s29 + $0x90] sm:$0xff]  ;;  %v292_v29 = vld [vmem:[%s4268_s29 + $0x98] sm:$0xff] }
  0x1b   : > { %258 = vst.msk [vmem:[#allocation2 + $0x138] sm:$0xff] %vm217_vm1, %v4140_v4  ;;  %259 = vst.msk [vmem:[#allocation2 + $0x140] sm:$0xff] %vm217_vm1, %v4140_v4  ;;  %v293_v30 = vld [vmem:[%s4268_s29 + $0xa0] sm:$0xff]  ;;  %v294_v31 = vld [vmem:[%s4268_s29 + $0xa8] sm:$0xff] }
  0x1c   : > { %261 = vst.msk [vmem:[#allocation2 + $0x150] sm:$0xff] %vm217_vm1, %v4140_v4  ;;  %262 = vst.msk [vmem:[#allocation2 + $0x158] sm:$0xff] %vm217_vm1, %v4140_v4  ;;  %v295_v51 = vld [vmem:[%s4268_s29 + $0xb0] sm:$0xff]  ;;  %v296_v52 = vld [vmem:[%s4268_s29 + $0xb8] sm:$0xff] }
  0x1d   : > { %263 = vst.msk [vmem:[#allocation2 + $0x160] sm:$0x3] %vm220_vm2, %v4140_v4  ;;  %266 = vst.msk [vmem:[#allocation2 + $0x178] sm:$0x3] %vm220_vm2, %v4140_v4  ;;  %v297_v53 = vld [vmem:[%s4268_s29 + $0xc0] sm:$0xff]  ;;  %v298_v54 = vld [vmem:[%s4268_s29 + $0xc8] sm:$0xff] }
  0x1e   : > { %264 = vst.msk [vmem:[#allocation2 + $0x168] sm:$0xff] %vm217_vm1, %v4140_v4  ;;  %265 = vst.msk [vmem:[#allocation2 + $0x170] sm:$0xff] %vm217_vm1, %v4140_v4  ;;  %v299_v57 = vld [vmem:[%s4268_s29 + $0xd0] sm:$0xff]  ;;  %v300_v58 = vld [vmem:[%s4268_s29 + $0xd8] sm:$0xff] }
  0x1f   : > { %267 = vst.msk [vmem:[#allocation2 + $0x180] sm:$0xff] %vm217_vm1, %v4140_v4  ;;  %268 = vst.msk [vmem:[#allocation2 + $0x188] sm:$0xff] %vm217_vm1, %v4140_v4  ;;  %v301_v59 = vld [vmem:[%s4268_s29 + $0xe0] sm:$0xff]  ;;  %v302_v60 = vld [vmem:[%s4268_s29 + $0xe8] sm:$0xff] }
  0x20   : > { %269 = vst.msk [vmem:[#allocation2 + $0x190] sm:$0x3] %vm220_vm2, %v4140_v4  ;;  %272 = vst.msk [vmem:[#allocation2 + $0x1a8] sm:$0x3] %vm220_vm2, %v4140_v4  ;;  %v304_v13 = vld [vmem:[%s4268_s29 + $0xf8] sm:$0xff] }
  0x21   : > { %270 = vst.msk [vmem:[#allocation2 + $0x198] sm:$0xff] %vm217_vm1, %v4140_v4  ;;  %271 = vst.msk [vmem:[#allocation2 + $0x1a0] sm:$0xff] %vm217_vm1, %v4140_v4 }
  0x22   : > { %306 = vst.msk [vmem:[#allocation2 + $0x19] sm:$0xff] %vm217_vm1, %v273_v7  ;;  %307 = vst.msk [vmem:[#allocation2 + $0x21] sm:$0xff] %vm217_vm1, %v274_v8 }
  0x23   : > { %308 = vst.msk [vmem:[#allocation2 + $0x31] sm:$0xff] %vm217_vm1, %v275_v9  ;;  %309 = vst.msk [vmem:[#allocation2 + $0x39] sm:$0xff] %vm217_vm1, %v276_v10 }
  0x24   : > { %310 = vst.msk [vmem:[#allocation2 + $0x49] sm:$0xff] %vm217_vm1, %v277_v11  ;;  %311 = vst.msk [vmem:[#allocation2 + $0x51] sm:$0xff] %vm217_vm1, %v278_v12  ;;  %v303_v12 = vld [vmem:[%s4268_s29 + $0xf0] sm:$0xff] }
  0x25   : > { %312 = vst.msk [vmem:[#allocation2 + $0x61] sm:$0xff] %vm217_vm1, %v279_v15  ;;  %313 = vst.msk [vmem:[#allocation2 + $0x69] sm:$0xff] %vm217_vm1, %v280_v17 }
  0x26   : > { %314 = vst.msk [vmem:[#allocation2 + $0x79] sm:$0xff] %vm217_vm1, %v281_v18  ;;  %315 = vst.msk [vmem:[#allocation2 + $0x81] sm:$0xff] %vm217_vm1, %v282_v19 }
  0x27   : > { %316 = vst.msk [vmem:[#allocation2 + $0x91] sm:$0xff] %vm217_vm1, %v283_v20  ;;  %317 = vst.msk [vmem:[#allocation2 + $0x99] sm:$0xff] %vm217_vm1, %v284_v21 }
  0x28   : > { %318 = vst.msk [vmem:[#allocation2 + $0xa9] sm:$0xff] %vm217_vm1, %v285_v22  ;;  %319 = vst.msk [vmem:[#allocation2 + $0xb1] sm:$0xff] %vm217_vm1, %v286_v23  ;;  %v2138_v23 = vsel %vm485_vm0, %v4327_v43, 0 }
  0x29   : > { %320 = vst.msk [vmem:[#allocation2 + $0xc1] sm:$0xff] %vm217_vm1, %v287_v24  ;;  %321 = vst.msk [vmem:[#allocation2 + $0xc9] sm:$0xff] %vm217_vm1, %v288_v25  ;;  %v389_v32 = vld [vmem:[#allocation2 + $0x19] sm:$0xff]  ;;  %v390_v33 = vld [vmem:[#allocation2 + $0x21] sm:$0xff] }
  0x2a   : > { %322 = vst.msk [vmem:[#allocation2 + $0xd9] sm:$0xff] %vm217_vm1, %v289_v26  ;;  %323 = vst.msk [vmem:[#allocation2 + $0xe1] sm:$0xff] %vm217_vm1, %v290_v27  ;;  %v1452_v34 = vld [vmem:[#allocation2 + $0x31] sm:$0xff]  ;;  %v420_v35 = vpack.c.bf16 %v390_v33, %v389_v32  ;;  %v1453_v37 = vld [vmem:[#allocation2 + $0x39] sm:$0xff] }
  0x2b   : > { %324 = vst.msk [vmem:[#allocation2 + $0xf1] sm:$0xff] %vm217_vm1, %v291_v28  ;;  %325 = vst.msk [vmem:[#allocation2 + $0xf9] sm:$0xff] %vm217_vm1, %v292_v29  ;;  %v393_v38 = vld [vmem:[#allocation2 + $0x49] sm:$0xff]  ;;  %v394_v39 = vld [vmem:[#allocation2 + $0x51] sm:$0xff]  ;;  %v4316_v40 = vpack.c.bf16 %v1453_v37, %v1452_v34 }
  0x2c   : > { %326 = vst.msk [vmem:[#allocation2 + $0x109] sm:$0xff] %vm217_vm1, %v293_v30  ;;  %327 = vst.msk [vmem:[#allocation2 + $0x111] sm:$0xff] %vm217_vm1, %v294_v31  ;;  %v4320_v42 = vpack.c.bf16 %v394_v39, %v393_v38  ;;  %3552 = vmatmul.mubr.msk.bf16.vlgmr.msra.gmra.mrb[0].mxu1 %vm217_vm1, %v420_v35  ;;  %3687 = vmatprep.mubr.msk.bf16.mxu0 %vm217_vm1, %v420_v35  ;;  %v1456_v45 = vld [vmem:[#allocation2 + $0x61] sm:$0xff]  ;;  %v1457_v46 = vld [vmem:[#allocation2 + $0x69] sm:$0xff] }
  0x2d   : > { %3584 = vmatpush3.bf16.msra.mxu1 %v699_v36  ;;  %3688 = vmatmul.mubr.msk.bf16.vlgmr.msra.gmra.mrb[0].mxu0 %vm217_vm1, %v4316_v40  ;;  %v397_v47 = vld [vmem:[#allocation2 + $0x79] sm:$0xff]  ;;  %v398_v48 = vld [vmem:[#allocation2 + $0x81] sm:$0xff]  ;;  %v4344_v49 = vpack.c.bf16 %v1457_v46, %v1456_v45  ;;  %328 = vst.msk [vmem:[#allocation2 + $0x121] sm:$0xff] %vm217_vm1, %v295_v51  ;;  %329 = vst.msk [vmem:[#allocation2 + $0x129] sm:$0xff] %vm217_vm1, %v296_v52 }
  0x2e   : > { %3720 = vmatpush3.bf16.msra.mxu0 %v1843_v41  ;;  %3555 = vmatprep.mubr.msk.bf16.mxu1 %vm217_vm1, %v4316_v40  ;;  %v4346_v50 = vpack.c.bf16 %v398_v48, %v397_v47  ;;  %330 = vst.msk [vmem:[#allocation2 + $0x139] sm:$0xff] %vm217_vm1, %v297_v53  ;;  %v1460_v55 = vld [vmem:[#allocation2 + $0x91] sm:$0xff]  ;;  %v1461_v56 = vld [vmem:[#allocation2 + $0x99] sm:$0xff]  ;;  %331 = vst.msk [vmem:[#allocation2 + $0x141] sm:$0xff] %vm217_vm1, %v298_v54 }
  0x2f   : > { %3691 = vmatprep.mubr.msk.bf16.mxu0 %vm217_vm1, %v4320_v42  ;;  %4120 = vmatprep.subr.msk.bf16.mxu0 %vm485_vm0, %v4327_v43  ;;  %332 = vst.msk [vmem:[#allocation2 + $0x151] sm:$0xff] %vm217_vm1, %v299_v57  ;;  %v401_v61 = vld [vmem:[#allocation2 + $0xa9] sm:$0xff]  ;;  %v402_v62 = vld [vmem:[#allocation2 + $0xb1] sm:$0xff]  ;;  %333 = vst.msk [vmem:[#allocation2 + $0x159] sm:$0xff] %vm217_vm1, %v300_v58  ;;  %v4372_v63 = vpack.c.bf16 %v1461_v56, %v1460_v55 }
  0x30   : > { %4115 = vmatprep.subr.msk.bf16.mxu1 %vm485_vm0, %v4334_v44  ;;  %334 = vst.msk [vmem:[#allocation2 + $0x169] sm:$0xff] %vm217_vm1, %v301_v59  ;;  %335 = vst.msk [vmem:[#allocation2 + $0x171] sm:$0xff] %vm217_vm1, %v302_v60  ;;  %v4374_v0 = vpack.c.bf16 %v402_v62, %v401_v61  ;;  %v1464_v2 = vld [vmem:[#allocation2 + $0xc1] sm:$0xff]  ;;  %v1465_v4 = vld [vmem:[#allocation2 + $0xc9] sm:$0xff] }
  0x31   : > { %v1744_v5 = vld [vmem:[#allocation2 + $0x1a] sm:$0xff]  ;;  %v1745_v6 = vld [vmem:[#allocation2 + $0x22] sm:$0xff]  ;;  %v4384_v7 = vpack.c.bf16 %v1465_v4, %v1464_v2  ;;  %v1746_v11 = vld [vmem:[#allocation2 + $0x32] sm:$0xff]  ;;  %336 = vst.msk [vmem:[#allocation2 + $0x181] sm:$0xff] %vm217_vm1, %v303_v12 }
  0x32   : > { %v4386_v8 = vpack.c.bf16 %v1745_v6, %v1744_v5  ;;  %v405_v9 = vld [vmem:[#allocation2 + $0xd9] sm:$0xff]  ;;  %v406_v10 = vld [vmem:[#allocation2 + $0xe1] sm:$0xff]  ;;  %v407_v15 = vld [vmem:[#allocation2 + $0xf1] sm:$0xff]  ;;  %337 = vst.msk [vmem:[#allocation2 + $0x189] sm:$0xff] %vm217_vm1, %v304_v13 }
  0x33   : > { %v1747_v14 = vld [vmem:[#allocation2 + $0x3a] sm:$0xff]  ;;  %v1748_v17 = vld [vmem:[#allocation2 + $0x4a] sm:$0xff]  ;;  %v1749_v18 = vld [vmem:[#allocation2 + $0x52] sm:$0xff]  ;;  %v4400_v19 = vpack.c.bf16 %v406_v10, %v405_v9 }
  0x34   : > { %3556 = vmatmul.mubr.msk.bf16.gmra.mrb[4].mxu1 %vm217_vm1, %v4320_v42  ;;  %v408_v16 = vld [vmem:[#allocation2 + $0xf9] sm:$0xff]  ;;  %v4402_v20 = vpack.c.bf16 %v1747_v14, %v1746_v11  ;;  %v4406_v22 = vpack.c.bf16 %v1749_v18, %v1748_v17  ;;  %v409_v25 = vld [vmem:[#allocation2 + $0x109] sm:$0xff]  ;;  %v410_v26 = vld [vmem:[#allocation2 + $0x111] sm:$0xff]  ;;  %v961_v18 = vsel %vm485_vm0, %v4334_v44, 0 }
  0x35   : > { %3692 = vmatmul.mubr.msk.bf16.gmra.mrb[4].mxu0 %vm217_vm1, %v4344_v49  ;;  %3559 = vmatprep.mubr.msk.bf16.mxu1 %vm217_vm1, %v4344_v49  ;;  %v4404_v21 = vpack.c.bf16 %v408_v16, %v407_v15  ;;  %v4415_v24 = vld [vmem:[%s4921_s1 + $0x1c] sm:$0xf]  ;;  %v1750_v27 = vld [vmem:[#allocation2 + $0x62] sm:$0xff]  ;;  %v1751_v28 = vld [vmem:[#allocation2 + $0x6a] sm:$0xff]  ;;  %v4425_v33 = vpack.c.bf16 %v410_v26, %v409_v25 }
  0x36   : > { %3695 = vmatprep.mubr.msk.bf16.mxu0 %vm217_vm1, %v4346_v50  ;;  %v411_v29 = vld [vmem:[#allocation2 + $0x121] sm:$0xff]  ;;  %v412_v30 = vld [vmem:[#allocation2 + $0x129] sm:$0xff]  ;;  %v4427_v34 = vpack.c.bf16 %v1751_v28, %v1750_v27  ;;  %v413_v37 = vld [vmem:[#allocation2 + $0x139] sm:$0xff] }
  0x37   : > { %v1752_v31 = vld [vmem:[#allocation2 + $0x7a] sm:$0xff]  ;;  %v1753_v32 = vld [vmem:[#allocation2 + $0x82] sm:$0xff]  ;;  %v4429_v35 = vpack.c.bf16 %v412_v30, %v411_v29  ;;  %v1754_v39 = vld [vmem:[#allocation2 + $0x92] sm:$0xff] }
  0x38   : > { %v4431_v36 = vpack.c.bf16 %v1753_v32, %v1752_v31  ;;  %v414_v38 = vld [vmem:[#allocation2 + $0x141] sm:$0xff]  ;;  %v415_v43 = vld [vmem:[#allocation2 + $0x151] sm:$0xff]  ;;  %v416_v45 = vld [vmem:[#allocation2 + $0x159] sm:$0xff] }
  0x39   : > { %v1755_v41 = vld [vmem:[#allocation2 + $0x9a] sm:$0xff]  ;;  %v1756_v46 = vld [vmem:[#allocation2 + $0xaa] sm:$0xff]  ;;  %v1757_v47 = vld [vmem:[#allocation2 + $0xb2] sm:$0xff]  ;;  %v4441_v48 = vpack.c.bf16 %v414_v38, %v413_v37  ;;  %v4445_v52 = vpack.c.bf16 %v416_v45, %v415_v43 }
  0x3a   : > { %v4443_v51 = vpack.c.bf16 %v1755_v41, %v1754_v39  ;;  %v4447_v53 = vpack.c.bf16 %v1757_v47, %v1756_v46  ;;  %v417_v54 = vld [vmem:[#allocation2 + $0x169] sm:$0xff]  ;;  %v418_v55 = vld [vmem:[#allocation2 + $0x171] sm:$0xff]  ;;  %v338_v58 = vld [vmem:[#allocation2] sm:$0xff] }
  0x3b   : > { %v1758_v56 = vld [vmem:[#allocation2 + $0xc2] sm:$0xff]  ;;  %v1759_v57 = vld [vmem:[#allocation2 + $0xca] sm:$0xff]  ;;  %v1760_v60 = vld [vmem:[#allocation2 + $0xda] sm:$0xff]  ;;  %v4457_v62 = vpack.c.bf16 %v418_v55, %v417_v54 }
  0x3c   : > { %3560 = vmatmul.mubr.msk.bf16.gmra.mrb[8].mxu1 %vm217_vm1, %v4346_v50  ;;  %v339_v59 = vld [vmem:[#allocation2 + $0x8] sm:$0xff]  ;;  %v4459_v2 = vpack.c.bf16 %v1759_v57, %v1758_v56  ;;  %v340_v6 = vld [vmem:[#allocation2 + $0x18] sm:$0xff]  ;;  %v341_v9 = vld [vmem:[#allocation2 + $0x20] sm:$0xff] }
  0x3d   : > { %3696 = vmatmul.mubr.msk.bf16.gmra.mrb[8].mxu0 %vm217_vm1, %v4372_v63  ;;  %3563 = vmatprep.mubr.msk.bf16.mxu1 %vm217_vm1, %v4372_v63  ;;  %v1761_v61 = vld [vmem:[#allocation2 + $0xe2] sm:$0xff]  ;;  %v370_v4 = vpack.c.bf16 %v339_v59, %v338_v58  ;;  %v1762_v10 = vld [vmem:[#allocation2 + $0xf2] sm:$0xff]  ;;  %v1763_v11 = vld [vmem:[#allocation2 + $0xfa] sm:$0xff]  ;;  %v4470_v16 = vpack.c.bf16 %v341_v9, %v340_v6 }
  0x3e   : > { %3699 = vmatprep.mubr.msk.bf16.mxu0 %vm217_vm1, %v4374_v0  ;;  %v4461_v5 = vpack.c.bf16 %v1761_v61, %v1760_v60  ;;  %v342_v12 = vld [vmem:[#allocation2 + $0x30] sm:$0xff]  ;;  %v343_v13 = vld [vmem:[#allocation2 + $0x38] sm:$0xff]  ;;  %v4472_v17 = vpack.c.bf16 %v1763_v11, %v1762_v10  ;;  %v4485_v26 = vld [vmem:[%s4921_s1 + $0xc] sm:$0xf] }
  0x3f   : > { %v1764_v14 = vld [vmem:[#allocation2 + $0x10a] sm:$0xff]  ;;  %v1765_v15 = vld [vmem:[#allocation2 + $0x112] sm:$0xff]  ;;  %v1766_v29 = vld [vmem:[#allocation2 + $0x122] sm:$0xff] }
  0x40   : > { %v4478_v25 = vpack.c.bf16 %v1765_v15, %v1764_v14  ;;  %v344_v27 = vld [vmem:[#allocation2 + $0x48] sm:$0xff]  ;;  %v345_v28 = vld [vmem:[#allocation2 + $0x50] sm:$0xff]  ;;  %v346_v30 = vld [vmem:[#allocation2 + $0x60] sm:$0xff] }
  0x41   : > { %v1767_v44 = vld [vmem:[#allocation2 + $0x12a] sm:$0xff]  ;;  %v1768_v32 = vld [vmem:[#allocation2 + $0x13a] sm:$0xff]  ;;  %v1769_v37 = vld [vmem:[#allocation2 + $0x142] sm:$0xff]  ;;  %v4495_v38 = vpack.c.bf16 %v345_v28, %v344_v27 }
  0x42   : > { %v347_v31 = vld [vmem:[#allocation2 + $0x68] sm:$0xff]  ;;  %v4497_v39 = vpack.c.bf16 %v1767_v44, %v1766_v29  ;;  %v4501_v43 = vpack.c.bf16 %v1769_v37, %v1768_v32  ;;  %v348_v45 = vld [vmem:[#allocation2 + $0x78] sm:$0xff]  ;;  %v349_v46 = vld [vmem:[#allocation2 + $0x80] sm:$0xff]  ;;  %v2432_v32 = vsel %vm485_vm0, %v4415_v24, 0 }
  0x43   : > { %v4499_v41 = vpack.c.bf16 %v347_v31, %v346_v30  ;;  %v1770_v47 = vld [vmem:[#allocation2 + $0x152] sm:$0xff]  ;;  %v1771_v54 = vld [vmem:[#allocation2 + $0x15a] sm:$0xff]  ;;  %v1772_v57 = vld [vmem:[#allocation2 + $0x16a] sm:$0xff]  ;;  %v4511_v59 = vpack.c.bf16 %v349_v46, %v348_v45 }
  0x44   : > { %3564 = vmatmul.mubr.msk.bf16.gmra.mrb[12].mxu1 %vm217_vm1, %v4374_v0  ;;  %v350_v55 = vld [vmem:[#allocation2 + $0x90] sm:$0xff]  ;;  %v351_v56 = vld [vmem:[#allocation2 + $0x98] sm:$0xff]  ;;  %v4513_v60 = vpack.c.bf16 %v1771_v54, %v1770_v47  ;;  %v352_v6 = vld [vmem:[#allocation2 + $0xa8] sm:$0xff] }
  0x45   : > { %3700 = vmatmul.mubr.msk.bf16.gmra.mrb[12].mxu0 %vm217_vm1, %v4384_v7  ;;  %3567 = vmatprep.mubr.msk.bf16.mxu1 %vm217_vm1, %v4384_v7  ;;  %v1773_v58 = vld [vmem:[#allocation2 + $0x172] sm:$0xff]  ;;  %v4515_v61 = vpack.c.bf16 %v351_v56, %v350_v55  ;;  %v354_v10 = vld [vmem:[#allocation2 + $0xc0] sm:$0xff]  ;;  %v360_v45 = vld [vmem:[#allocation2 + $0x108] sm:$0xff] }
  0x46   : > { %3721 = vmatprep.mubr.msk.bf16.mxu0 %vm217_vm1, %v4386_v8  ;;  %v353_v9 = vld [vmem:[#allocation2 + $0xb0] sm:$0xff]  ;;  %v1774_v11 = vld [vmem:[#allocation2 + $0x182] sm:$0xff]  ;;  %v356_v27 = vld [vmem:[#allocation2 + $0xd8] sm:$0xff] }
  0x47   : > { %v4527_v14 = vpack.c.bf16 %v353_v9, %v352_v6  ;;  %v357_v28 = vld [vmem:[#allocation2 + $0xe0] sm:$0xff]  ;;  %v358_v29 = vld [vmem:[#allocation2 + $0xf0] sm:$0xff]  ;;  %v359_v44 = vld [vmem:[#allocation2 + $0xf8] sm:$0xff] }
  0x48   : > { %v4541_v30 = vpack.c.bf16 %v357_v28, %v356_v27  ;;  %v4543_v31 = vpack.c.bf16 %v359_v44, %v358_v29  ;;  %v3376_v37 = vld [vmem:[%s4921_s1 + $0x20] sm:$0xf]  ;;  %v361_v46 = vld [vmem:[#allocation2 + $0x110] sm:$0xff]  ;;  %v363_v47 = vld [vmem:[#allocation2 + $0x128] sm:$0xff]  ;;  %v1255_v44 = vsel %vm485_vm0, %v4485_v26, 0 }
  0x49   : > { %v4559_v54 = vpack.c.bf16 %v361_v46, %v360_v45  ;;  %v364_v56 = vld [vmem:[#allocation2 + $0x138] sm:$0xff]  ;;  %v863_v27 = vld [vmem:[#allocation2 + $0xa] sm:$0xff]  ;;  %v2070_v45 = vld [vmem:[#allocation2 + $0x1a0] sm:$0xff] }
  0x4a   : > { %v367_v6 = vld [vmem:[#allocation2 + $0x158] sm:$0xff] }
  0x4c   : > { %3568 = vmatmul.mubr.msk.bf16.gmra.mrb[16].mxu1 %vm217_vm1, %v4400_v19 }
  0x4d   : > { %3722 = vmatmul.mubr.msk.bf16.vlgmr.msra.gmra.mrb[0].mxu0 %vm217_vm1, %v4402_v20  ;;  %3571 = vmatprep.mubr.msk.bf16.mxu1 %vm217_vm1, %v4404_v21 }
  0x4e   : > { %3754 = vmatpush3.bf16.msra.mxu0 %v2138_v23  ;;  %3725 = vmatprep.mubr.msk.bf16.mxu0 %vm217_vm1, %v4406_v22  ;;  %v4476_v23 = vpack.c.bf16 %v343_v13, %v342_v12  ;;  %v1775_v12 = vld [vmem:[#allocation2 + $0x18a] sm:$0xff] }
  0x4f   : > { %4121 = vmatprep.subr.msk.bf16.mxu0 %vm485_vm0, %v4415_v24  ;;  %v355_v13 = vld [vmem:[#allocation2 + $0xc8] sm:$0xff]  ;;  %v4529_v15 = vpack.c.bf16 %v1775_v12, %v1774_v11  ;;  %v362_v24 = vld [vmem:[#allocation2 + $0x120] sm:$0xff]  ;;  %v369_v12 = vld [vmem:[#allocation2 + $0x170] sm:$0xff] }
  0x50   : > { %v4561_v55 = vpack.c.bf16 %v363_v47, %v362_v24  ;;  %v368_v11 = vld [vmem:[#allocation2 + $0x168] sm:$0xff]  ;;  %v2726_v24 = vsel %vm485_vm0, %v3376_v37, 0 }
  0x51   : > { %v4583_v28 = vpack.c.bf16 %v369_v12, %v368_v11 }
  0x54   : > { %3572 = vmatmul.mubr.msk.bf16.gmra.mrb[20].mxu1 %vm217_vm1, %v4425_v33 }
  0x55   : > { %3726 = vmatmul.mubr.msk.bf16.gmra.mrb[4].mxu0 %vm217_vm1, %v4427_v34  ;;  %3575 = vmatprep.mubr.msk.bf16.mxu1 %vm217_vm1, %v4429_v35 }
  0x56   : > { %3729 = vmatprep.mubr.msk.bf16.mxu0 %vm217_vm1, %v4431_v36 }
  0x5c   : > { %3576 = vmatmul.mubr.msk.bf16.gmra.mrb[24].mxu1 %vm217_vm1, %v4441_v48 }
  0x5d   : > { %3730 = vmatmul.mubr.msk.bf16.gmra.mrb[8].mxu0 %vm217_vm1, %v4443_v51  ;;  %3579 = vmatprep.mubr.msk.bf16.mxu1 %vm217_vm1, %v4445_v52 }
  0x5e   : > { %3733 = vmatprep.mubr.msk.bf16.mxu0 %vm217_vm1, %v4447_v53 }
  0x64   : > { %3580 = vmatmul.mubr.msk.bf16.gmra.mrb[28].mxu1 %vm217_vm1, %v4457_v62 }
  0x65   : > { %3734 = vmatmul.mubr.msk.bf16.gmra.mrb[12].mxu0 %vm217_vm1, %v4459_v2  ;;  %3585 = vmatprep.mubr.msk.bf16.mxu1 %vm217_vm1, %v370_v4  ;;  %v4517_v4 = vpack.c.bf16 %v1773_v58, %v1772_v57  ;;  %v365_v57 = vld [vmem:[#allocation2 + $0x140] sm:$0xff]  ;;  %v366_v58 = vld [vmem:[#allocation2 + $0x150] sm:$0xff] }
  0x66   : > { %3737 = vmatprep.mubr.msk.bf16.mxu0 %vm217_vm1, %v4461_v5  ;;  %v4571_v9 = vpack.c.bf16 %v365_v57, %v364_v56 }
  0x6c   : > { %3586 = vmatmul.mubr.msk.bf16.vlgmr.msra.gmra.mrb[0].mxu1 %vm217_vm1, %v4470_v16 }
  0x6d   : > { %3618 = vmatpush3.bf16.msra.mxu1 %v961_v18  ;;  %3738 = vmatmul.mubr.msk.bf16.gmra.mrb[16].mxu0 %vm217_vm1, %v4472_v17  ;;  %v4531_v18 = vpack.c.bf16 %v355_v13, %v354_v10  ;;  %v4573_v10 = vpack.c.bf16 %v367_v6, %v366_v58  ;;  %v862_v13 = vld [vmem:[#allocation2 + $0x2] sm:$0xff] }
  0x6e   : > { %3589 = vmatprep.mubr.msk.bf16.mxu1 %vm217_vm1, %v4476_v23  ;;  %3741 = vmatprep.mubr.msk.bf16.mxu0 %vm217_vm1, %v4478_v25  ;;  %v894_v29 = vpack.c.bf16 %v863_v27, %v862_v13 }
  0x6f   : > { %4116 = vmatprep.subr.msk.bf16.mxu1 %vm485_vm0, %v4485_v26  ;;  %v2068_v26 = vld [vmem:[#allocation2 + $0x188] sm:$0xff] }
  0x74   : > { %3590 = vmatmul.mubr.msk.bf16.gmra.mrb[4].mxu1 %vm217_vm1, %v4495_v38 }
  0x75   : > { %3742 = vmatmul.mubr.msk.bf16.gmra.mrb[20].mxu0 %vm217_vm1, %v4497_v39  ;;  %3593 = vmatprep.mubr.msk.bf16.mxu1 %vm217_vm1, %v4499_v41 }
  0x76   : > { %3745 = vmatprep.mubr.msk.bf16.mxu0 %vm217_vm1, %v4501_v43 }
  0x7c   : > { %3594 = vmatmul.mubr.msk.bf16.gmra.mrb[8].mxu1 %vm217_vm1, %v4511_v59 }
  0x7d   : > { %3746 = vmatmul.mubr.msk.bf16.gmra.mrb[24].mxu0 %vm217_vm1, %v4513_v60  ;;  %3597 = vmatprep.mubr.msk.bf16.mxu1 %vm217_vm1, %v4515_v61 }
  0x7e   : > { %3749 = vmatprep.mubr.msk.bf16.mxu0 %vm217_vm1, %v4517_v4 }
  0x84   : > { %3598 = vmatmul.mubr.msk.bf16.gmra.mrb[12].mxu1 %vm217_vm1, %v4527_v14 }
  0x85   : > { %3750 = vmatmul.mubr.msk.bf16.gmra.mrb[28].mxu0 %vm217_vm1, %v4529_v15  ;;  %3601 = vmatprep.mubr.msk.bf16.mxu1 %vm217_vm1, %v4531_v18 }
  0x86   : > { %3755 = vmatprep.mubr.msk.bf16.mxu0 %vm217_vm1, %v4476_v23 }
  0x8c   : > { %3602 = vmatmul.mubr.msk.bf16.gmra.mrb[16].mxu1 %vm217_vm1, %v4541_v30 }
  0x8d   : > { %3756 = vmatmul.mubr.msk.bf16.vlgmr.msra.gmra.mrb[0].mxu0 %vm217_vm1, %v4495_v38  ;;  %3605 = vmatprep.mubr.msk.bf16.mxu1 %vm217_vm1, %v4543_v31 }
  0x8e   : > { %3788 = vmatpush3.bf16.msra.mxu0 %v2432_v32  ;;  %3759 = vmatprep.mubr.msk.bf16.mxu0 %vm217_vm1, %v4499_v41 }
  0x8f   : > { %4122 = vmatprep.subr.msk.bf16.mxu0 %vm485_vm0, %v3376_v37 }
  0x94   : > { %3606 = vmatmul.mubr.msk.bf16.gmra.mrb[20].mxu1 %vm217_vm1, %v4559_v54 }
  0x95   : > { %3760 = vmatmul.mubr.msk.bf16.gmra.mrb[4].mxu0 %vm217_vm1, %v4511_v59  ;;  %3609 = vmatprep.mubr.msk.bf16.mxu1 %vm217_vm1, %v4561_v55 }
  0x96   : > { %3763 = vmatprep.mubr.msk.bf16.mxu0 %vm217_vm1, %v4515_v61 }
  0x9c   : > { %3610 = vmatmul.mubr.msk.bf16.gmra.mrb[24].mxu1 %vm217_vm1, %v4571_v9 }
  0x9d   : > { %3764 = vmatmul.mubr.msk.bf16.gmra.mrb[8].mxu0 %vm217_vm1, %v4527_v14  ;;  %3613 = vmatprep.mubr.msk.bf16.mxu1 %vm217_vm1, %v4573_v10 }
  0x9e   : > { %3767 = vmatprep.mubr.msk.bf16.mxu0 %vm217_vm1, %v4531_v18 }
  0xa4   : > { %3614 = vmatmul.mubr.msk.bf16.gmra.mrb[28].mxu1 %vm217_vm1, %v4583_v28 }
  0xa5   : > { %3768 = vmatmul.mubr.msk.bf16.gmra.mrb[12].mxu0 %vm217_vm1, %v4541_v30  ;;  %3619 = vmatprep.mubr.msk.bf16.mxu1 %vm217_vm1, %v894_v29 }
  0xa6   : > { %3771 = vmatprep.mubr.msk.bf16.mxu0 %vm217_vm1, %v4543_v31 }
  0xac   : > { %3620 = vmatmul.mubr.msk.bf16.vlgmr.msra.gmra.mrb[0].mxu1 %vm217_vm1, %v4386_v8  ;;  %v2067_v8 = vld [vmem:[#allocation2 + $0x180] sm:$0xff] }
  0xad   : > { %3652 = vmatpush3.bf16.msra.mxu1 %v1255_v44  ;;  %3772 = vmatmul.mubr.msk.bf16.gmra.mrb[16].mxu0 %vm217_vm1, %v4559_v54  ;;  %v4612_v32 = vpack.c.bf16 %v2068_v26, %v2067_v8 }
  0xae   : > { %3623 = vmatprep.mubr.msk.bf16.mxu1 %vm217_vm1, %v4402_v20  ;;  %3775 = vmatprep.mubr.msk.bf16.mxu0 %vm217_vm1, %v4561_v55 }
  0xaf   : > { %4118 = vmatprep.subr.msk.bf16.mxu1 %vm485_vm0, %v4182_v1  ;;  %v2069_v1 = vld [vmem:[#allocation2 + $0x198] sm:$0xff] }
  0xb0   : > { %v2086_v46 = vpack.c.bf16 %v2070_v45, %v2069_v1 }
  0xb4   : > { %3624 = vmatmul.mubr.msk.bf16.gmra.mrb[4].mxu1 %vm217_vm1, %v4406_v22 }
  0xb5   : > { %3776 = vmatmul.mubr.msk.bf16.gmra.mrb[20].mxu0 %vm217_vm1, %v4571_v9  ;;  %3627 = vmatprep.mubr.msk.bf16.mxu1 %vm217_vm1, %v4427_v34 }
  0xb6   : > { %3779 = vmatprep.mubr.msk.bf16.mxu0 %vm217_vm1, %v4573_v10 }
  0xbc   : > { %3628 = vmatmul.mubr.msk.bf16.gmra.mrb[8].mxu1 %vm217_vm1, %v4431_v36 }
  0xbd   : > { %3780 = vmatmul.mubr.msk.bf16.gmra.mrb[24].mxu0 %vm217_vm1, %v4583_v28  ;;  %3631 = vmatprep.mubr.msk.bf16.mxu1 %vm217_vm1, %v4443_v51 }
  0xbe   : > { %3783 = vmatprep.mubr.msk.bf16.mxu0 %vm217_vm1, %v4612_v32 }
  0xc4   : > { %3632 = vmatmul.mubr.msk.bf16.gmra.mrb[12].mxu1 %vm217_vm1, %v4447_v53 }
  0xc5   : > { %3784 = vmatmul.mubr.msk.bf16.gmra.mrb[28].mxu0 %vm217_vm1, %v2086_v46  ;;  %3635 = vmatprep.mubr.msk.bf16.mxu1 %vm217_vm1, %v4459_v2 }
  0xc6   : > { %3789 = vmatprep.mubr.msk.bf16.mxu0 %vm217_vm1, %v4316_v40  ;;  %v2362_v40 = vld [vmem:[#allocation2 + $0x189] sm:$0xff] }
  0xcc   : > { %3636 = vmatmul.mubr.msk.bf16.gmra.mrb[16].mxu1 %vm217_vm1, %v4461_v5 }
  0xcd   : > { %3790 = vmatmul.mubr.msk.bf16.vlgmr.msra.gmra.mrb[0].mxu0 %vm217_vm1, %v4320_v42  ;;  %3639 = vmatprep.mubr.msk.bf16.mxu1 %vm217_vm1, %v4472_v17 }
  0xce   : > { %3822 = vmatpush3.bf16.msra.mxu0 %v2726_v24  ;;  %3793 = vmatprep.mubr.msk.bf16.mxu0 %vm217_vm1, %v4344_v49  ;;  %v2363_v49 = vld [vmem:[#allocation2 + $0x199] sm:$0xff] }
  0xd4   : > { %3640 = vmatmul.mubr.msk.bf16.gmra.mrb[20].mxu1 %vm217_vm1, %v4478_v25 }
  0xd5   : > { %3794 = vmatmul.mubr.msk.bf16.gmra.mrb[4].mxu0 %vm217_vm1, %v4346_v50  ;;  %3643 = vmatprep.mubr.msk.bf16.mxu1 %vm217_vm1, %v4497_v39  ;;  %v2364_v50 = vld [vmem:[#allocation2 + $0x1a1] sm:$0xff] }
  0xd6   : > { %3797 = vmatprep.mubr.msk.bf16.mxu0 %vm217_vm1, %v4372_v63  ;;  %v2380_v63 = vpack.c.bf16 %v2364_v50, %v2363_v49 }
  0xdc   : > { %3644 = vmatmul.mubr.msk.bf16.gmra.mrb[24].mxu1 %vm217_vm1, %v4501_v43 }
  0xdd   : > { %3798 = vmatmul.mubr.msk.bf16.gmra.mrb[8].mxu0 %vm217_vm1, %v4374_v0  ;;  %3647 = vmatprep.mubr.msk.bf16.mxu1 %vm217_vm1, %v4513_v60  ;;  %v2657_v0 = vld [vmem:[#allocation2 + $0x19a] sm:$0xff] }
  0xde   : > { %3801 = vmatprep.mubr.msk.bf16.mxu0 %vm217_vm1, %v4384_v7  ;;  %v2658_v7 = vld [vmem:[#allocation2 + $0x1a2] sm:$0xff] }
  0xe4   : > { %3648 = vmatmul.mubr.msk.bf16.gmra.mrb[28].mxu1 %vm217_vm1, %v4517_v4 }
  0xe5   : > { %3802 = vmatmul.mubr.msk.bf16.gmra.mrb[12].mxu0 %vm217_vm1, %v4400_v19  ;;  %3653 = vmatprep.mubr.msk.bf16.mxu1 %vm217_vm1, %v4470_v16 }
  0xe6   : > { %3805 = vmatprep.mubr.msk.bf16.mxu0 %vm217_vm1, %v4404_v21 }
  0xec   : > { %3654 = vmatmul.mubr.msk.bf16.vlgmr.msra.gmra.mrb[0].mxu1 %vm217_vm1, %v4476_v23 }
  0xed   : > { %3856 = vmatpush3.bf16.msra.mxu1 %v4190_v3  ;;  %3806 = vmatmul.mubr.msk.bf16.gmra.mrb[16].mxu0 %vm217_vm1, %v4425_v33  ;;  %v2361_v3 = vld [vmem:[#allocation2 + $0x181] sm:$0xff] }
  0xee   : > { %3657 = vmatprep.mubr.msk.bf16.mxu1 %vm217_vm1, %v4495_v38  ;;  %3809 = vmatprep.mubr.msk.bf16.mxu0 %vm217_vm1, %v4429_v35  ;;  %v2379_v42 = vpack.c.bf16 %v2362_v40, %v2361_v3 }
  0xf4   : > { %3658 = vmatmul.mubr.msk.bf16.gmra.mrb[4].mxu1 %vm217_vm1, %v4499_v41 }
  0xf5   : > { %3810 = vmatmul.mubr.msk.bf16.gmra.mrb[20].mxu0 %vm217_vm1, %v4441_v48  ;;  %3661 = vmatprep.mubr.msk.bf16.mxu1 %vm217_vm1, %v4511_v59 }
  0xf6   : > { %3813 = vmatprep.mubr.msk.bf16.mxu0 %vm217_vm1, %v4445_v52 }
  0xfc   : > { %3662 = vmatmul.mubr.msk.bf16.gmra.mrb[8].mxu1 %vm217_vm1, %v4515_v61 }
  0xfd   : > { %3814 = vmatmul.mubr.msk.bf16.gmra.mrb[24].mxu0 %vm217_vm1, %v4457_v62  ;;  %3665 = vmatprep.mubr.msk.bf16.mxu1 %vm217_vm1, %v4527_v14 }
  0xfe   : > { %3817 = vmatprep.mubr.msk.bf16.mxu0 %vm217_vm1, %v2379_v42 }
 0x104   : > { %3666 = vmatmul.mubr.msk.bf16.gmra.mrb[12].mxu1 %vm217_vm1, %v4531_v18 }
 0x105   : > { %3818 = vmatmul.mubr.msk.bf16.gmra.mrb[28].mxu0 %vm217_vm1, %v2380_v63  ;;  %3669 = vmatprep.mubr.msk.bf16.mxu1 %vm217_vm1, %v4541_v30 }
 0x106   : > { %3823 = vmatprep.mubr.msk.bf16.mxu0 %vm217_vm1, %v4402_v20 }
 0x10c   : > { %3670 = vmatmul.mubr.msk.bf16.gmra.mrb[16].mxu1 %vm217_vm1, %v4543_v31 }
 0x10d   : > { %3824 = vmatmul.mubr.msk.bf16.vlgmr.msra.gmra.mrb[0].mxu0 %vm217_vm1, %v4406_v22  ;;  %3673 = vmatprep.mubr.msk.bf16.mxu1 %vm217_vm1, %v4559_v54 }
 0x10e   : > { %3827 = vmatprep.mubr.msk.bf16.mxu0 %vm217_vm1, %v4427_v34 }
 0x114   : > { %3674 = vmatmul.mubr.msk.bf16.gmra.mrb[20].mxu1 %vm217_vm1, %v4561_v55 }
 0x115   : > { %3828 = vmatmul.mubr.msk.bf16.gmra.mrb[4].mxu0 %vm217_vm1, %v4431_v36  ;;  %3677 = vmatprep.mubr.msk.bf16.mxu1 %vm217_vm1, %v4571_v9 }
 0x116   : > { %3831 = vmatprep.mubr.msk.bf16.mxu0 %vm217_vm1, %v4443_v51 }
 0x11c   : > { %3678 = vmatmul.mubr.msk.bf16.gmra.mrb[24].mxu1 %vm217_vm1, %v4573_v10 }
 0x11d   : > { %3832 = vmatmul.mubr.msk.bf16.gmra.mrb[8].mxu0 %vm217_vm1, %v4447_v53  ;;  %3681 = vmatprep.mubr.msk.bf16.mxu1 %vm217_vm1, %v4583_v28 }
 0x11e   : > { %3835 = vmatprep.mubr.msk.bf16.mxu0 %vm217_vm1, %v4459_v2 }
 0x124   : > { %3682 = vmatmul.mubr.msk.bf16.gmra.mrb[28].mxu1 %vm217_vm1, %v4612_v32 }
 0x125   : > { %3836 = vmatmul.mubr.msk.bf16.gmra.mrb[12].mxu0 %vm217_vm1, %v4461_v5  ;;  %3703 = vmatprep.mubr.msk.bf16.mxu1 %vm217_vm1, %v4400_v19  ;;  %v2674_v19 = vpack.c.bf16 %v2658_v7, %v2657_v0 }
 0x126   : > { %3839 = vmatprep.mubr.msk.bf16.mxu0 %vm217_vm1, %v4472_v17 }
 0x12c   : > { %3704 = vmatmul.mubr.msk.bf16.vlgmr.msra.gmra.mrb[16].mxu1 %vm217_vm1, %v4404_v21 }
 0x12d   : > { %3840 = vmatmul.mubr.msk.bf16.gmra.mrb[16].mxu0 %vm217_vm1, %v4478_v25  ;;  %3707 = vmatprep.mubr.msk.bf16.mxu1 %vm217_vm1, %v4425_v33 }
 0x12e   : > { %3843 = vmatprep.mubr.msk.bf16.mxu0 %vm217_vm1, %v4497_v39 }
 0x134   : > { %3708 = vmatmul.mubr.msk.bf16.gmra.mrb[20].mxu1 %vm217_vm1, %v4429_v35 }
 0x135   : > { %3844 = vmatmul.mubr.msk.bf16.gmra.mrb[20].mxu0 %vm217_vm1, %v4501_v43  ;;  %3711 = vmatprep.mubr.msk.bf16.mxu1 %vm217_vm1, %v4441_v48 }
 0x136   : > { %3847 = vmatprep.mubr.msk.bf16.mxu0 %vm217_vm1, %v4513_v60 }
 0x13c   : > { %3712 = vmatmul.mubr.msk.bf16.gmra.mrb[24].mxu1 %vm217_vm1, %v4445_v52 }
 0x13d   : > { %3848 = vmatmul.mubr.msk.bf16.gmra.mrb[24].mxu0 %vm217_vm1, %v4517_v4  ;;  %3715 = vmatprep.mubr.msk.bf16.mxu1 %vm217_vm1, %v4457_v62 }
 0x13e   : > { %3851 = vmatprep.mubr.msk.bf16.mxu0 %vm217_vm1, %v4529_v15 }
 0x144   : > { %3716 = vmatmul.mubr.msk.bf16.gmra.mrb[28].mxu1 %vm217_vm1, %v2379_v42 }
 0x145   : > { %3852 = vmatmul.mubr.msk.bf16.gmra.mrb[28].mxu0 %vm217_vm1, %v2674_v19 }
 0x1bf   : > { %v3655_v20 = vpop.f32.mrb[0].mxu1 }
 0x1c0   : > { %v1291_v21 = vpop.f32.mrb[1].mxu1 }
 0x1c1   : > { %v3656_v22 = vpop.f32.mrb[2].mxu1 }
 0x1c2   : > { %v1294_v33 = vpop.f32.mrb[3].mxu1 }
 0x1c7   : > { %v3659_v34 = vpop.f32.mrb[4].mxu1 }
 0x1c8   : > { %v1307_v35 = vpop.f32.mrb[5].mxu1 }
 0x1c9   : > { %v3660_v36 = vpop.f32.mrb[6].mxu1 }
 0x1ca   : > { %v1310_v48 = vpop.f32.mrb[7].mxu1 }
 0x1cf   : > { %v4751_v51 = vpop.f32.mrb[8].mxu1 }
 0x1d0   : > { %v4753_v52 = vpop.f32.mrb[9].mxu1 }
 0x1d1   : > { %v4755_v53 = vpop.f32.mrb[10].mxu1 }
 0x1d2   : > { %v4757_v62 = vpop.f32.mrb[11].mxu1 }
 0x1d7   : > { %v4760_v2 = vpop.f32.mrb[12].mxu1 }
 0x1d8   : > { %v4762_v5 = vpop.f32.mrb[13].mxu1 }
 0x1d9   : > { %v4764_v16 = vpop.f32.mrb[14].mxu1 }
 0x1da   : > { %v4766_v17 = vpop.f32.mrb[15].mxu1 }
 0x1e0   : > { %v3825_v23 = vpop.f32.mrb[0].mxu0 }
 0x1e1   : > { %v3857_v25 = vadd.f32 %v3825_v23, %v3655_v20  ;;  %v2762_v38 = vpop.f32.mrb[1].mxu0 }
 0x1e2   : > { %v3858_v39 = vadd.f32 %v2762_v38, %v1291_v21  ;;  %v3826_v41 = vpop.f32.mrb[2].mxu0 }
 0x1e3   : > { %2923 = vst.msk [vmem:[%s4771_s20 + $0x10] sm:$0xff] %vm217_vm1, %v3857_v25  ;;  %v3859_v43 = vadd.f32 %v3826_v41, %v3656_v22  ;;  %v2765_v59 = vpop.f32.mrb[3].mxu0  ;;  %v3026_v4 = vmul.f32 %v3857_v25, %v3857_v25  ;;  %v2956_v37 = vsel %vm217_vm1, %v3857_v25, 0.0 }
 0x1e4   : > { %2921 = vst.msk [vmem:[%s4771_s20] sm:$0xff] %vm217_vm1, %v3858_v39  ;;  %v3024_v60 = vmul.f32 %v3858_v39, %v3858_v39  ;;  %v3860_v61 = vadd.f32 %v2765_v59, %v1294_v33  ;;  %v2953_v14 = vsel %vm217_vm1, %v3858_v39, 0.0 }
 0x1e5   : > { %2924 = vst.msk [vmem:[%s4771_s20 + $0x18] sm:$0xff] %vm217_vm1, %v3859_v43  ;;  %v3027_v30 = vmul.f32 %v3859_v43, %v3859_v43  ;;  %v3059_v9 = vsel %vm217_vm1, %v3026_v4, 0.0  ;;  %v2958_v10 = vsel %vm217_vm1, %v3859_v43, 0.0 }
 0x1e6   : > { %2922 = vst.msk [vmem:[%s4771_s20 + $0x8] sm:$0xff] %vm217_vm1, %v3860_v61  ;;  %v2954_v15 = vsel %vm217_vm1, %v3860_v61, 0.0  ;;  %v3025_v18 = vmul.f32 %v3860_v61, %v3860_v61  ;;  %v3056_v47 = vsel %vm217_vm1, %v3024_v60, 0.0 }
 0x1e7   : > { %v2955_v31 = vadd.f32 %v2954_v15, %v2953_v14  ;;  %v3061_v13 = vsel %vm217_vm1, %v3027_v30, 0.0 }
 0x1e8   : > { %v3057_v54 = vsel %vm217_vm1, %v3025_v18, 0.0  ;;  %v3829_v55 = vpop.f32.mrb[4].mxu0 }
 0x1e9   : > { %v2957_v56 = vadd.f32 %v2956_v37, %v2955_v31  ;;  %v3058_v57 = vadd.f32 %v3057_v54, %v3056_v47  ;;  %v3861_v58 = vadd.f32 %v3829_v55, %v3659_v34  ;;  %v2778_v6 = vpop.f32.mrb[5].mxu0 }
 0x1ea   : > { %v3862_v11 = vadd.f32 %v2778_v6, %v1307_v35  ;;  %v3830_v12 = vpop.f32.mrb[6].mxu0 }
 0x1eb   : > { %v3060_v27 = vadd.f32 %v3059_v9, %v3058_v57  ;;  %2927 = vst.msk [vmem:[%s4771_s20 + $0x30] sm:$0xff] %vm217_vm1, %v3861_v58  ;;  %v2959_v28 = vadd.f32 %v2958_v10, %v2957_v56  ;;  %v2781_v29 = vpop.f32.mrb[7].mxu0  ;;  %v3863_v26 = vadd.f32 %v3830_v12, %v3660_v36  ;;  %v3030_v3 = vmul.f32 %v3861_v58, %v3861_v58 }
 0x1ec   : > { %2925 = vst.msk [vmem:[%s4771_s20 + $0x20] sm:$0xff] %vm217_vm1, %v3862_v11  ;;  %v2960_v44 = vsel %vm217_vm1, %v3862_v11, 0.0  ;;  %v3028_v8 = vmul.f32 %v3862_v11, %v3862_v11  ;;  %v3864_v32 = vadd.f32 %v2781_v29, %v1310_v48  ;;  %v2964_v50 = vsel %vm217_vm1, %v3861_v58, 0.0 }
 0x1ed   : > { %v2961_v1 = vadd.f32 %v2960_v44, %v2959_v28  ;;  %v3062_v45 = vadd.f32 %v3061_v13, %v3060_v27  ;;  %2928 = vst.msk [vmem:[%s4771_s20 + $0x38] sm:$0xff] %vm217_vm1, %v3863_v26  ;;  %v3031_v0 = vmul.f32 %v3863_v26, %v3863_v26  ;;  %v2966_v22 = vsel %vm217_vm1, %v3863_v26, 0.0 }
 0x1ee   : > { %v3063_v46 = vsel %vm217_vm1, %v3028_v8, 0.0  ;;  %2926 = vst.msk [vmem:[%s4771_s20 + $0x28] sm:$0xff] %vm217_vm1, %v3864_v32  ;;  %v2962_v24 = vsel %vm217_vm1, %v3864_v32, 0.0  ;;  %v3029_v49 = vmul.f32 %v3864_v32, %v3864_v32  ;;  %v3067_v36 = vsel %vm217_vm1, %v3030_v3, 0.0 }
 0x1ef   : > { %v3064_v40 = vadd.f32 %v3063_v46, %v3062_v45  ;;  %v2963_v42 = vadd.f32 %v2962_v24, %v2961_v1 }
 0x1f0   : > { %v3833_v63 = vpop.f32.mrb[8].mxu0  ;;  %v3065_v19 = vsel %vm217_vm1, %v3029_v49, 0.0 }
 0x1f1   : > { %v2965_v7 = vadd.f32 %v2964_v50, %v2963_v42  ;;  %v3865_v20 = vadd.f32 %v3833_v63, %v4751_v51  ;;  %v2794_v21 = vpop.f32.mrb[9].mxu0  ;;  %v3066_v33 = vadd.f32 %v3065_v19, %v3064_v40 }
 0x1f2   : > { %v3866_v34 = vadd.f32 %v2794_v21, %v4753_v52  ;;  %v3834_v35 = vpop.f32.mrb[10].mxu0  ;;  %v3069_v52 = vsel %vm217_vm1, %v3031_v0, 0.0 }
 0x1f3   : > { %2931 = vst.msk [vmem:[%s4771_s20 + $0x50] sm:$0xff] %vm217_vm1, %v3865_v20  ;;  %v2967_v48 = vadd.f32 %v2966_v22, %v2965_v7  ;;  %v3867_v23 = vadd.f32 %v3834_v35, %v4755_v53  ;;  %v2797_v25 = vpop.f32.mrb[11].mxu0  ;;  %v3068_v38 = vadd.f32 %v3067_v36, %v3066_v33  ;;  %v3034_v4 = vmul.f32 %v3865_v20, %v3865_v20 }
 0x1f4   : > { %2929 = vst.msk [vmem:[%s4771_s20 + $0x40] sm:$0xff] %vm217_vm1, %v3866_v34  ;;  %v2968_v51 = vsel %vm217_vm1, %v3866_v34, 0.0  ;;  %v3032_v39 = vmul.f32 %v3866_v34, %v3866_v34  ;;  %v3868_v41 = vadd.f32 %v2797_v25, %v4757_v62  ;;  %v2972_v15 = vsel %vm217_vm1, %v3865_v20, 0.0 }
 0x1f5   : > { %v2969_v43 = vadd.f32 %v2968_v51, %v2967_v48  ;;  %2932 = vst.msk [vmem:[%s4771_s20 + $0x58] sm:$0xff] %vm217_vm1, %v3867_v23  ;;  %v3070_v59 = vadd.f32 %v3069_v52, %v3068_v38  ;;  %v3035_v31 = vmul.f32 %v3867_v23, %v3867_v23  ;;  %v2974_v55 = vsel %vm217_vm1, %v3867_v23, 0.0 }
 0x1f6   : > { %v3071_v60 = vsel %vm217_vm1, %v3032_v39, 0.0  ;;  %2930 = vst.msk [vmem:[%s4771_s20 + $0x48] sm:$0xff] %vm217_vm1, %v3868_v41  ;;  %v2970_v53 = vsel %vm217_vm1, %v3868_v41, 0.0  ;;  %v3033_v61 = vmul.f32 %v3868_v41, %v3868_v41  ;;  %v3075_v6 = vsel %vm217_vm1, %v3034_v4, 0.0 }
 0x1f7   : > { %v2971_v14 = vadd.f32 %v2970_v53, %v2969_v43  ;;  %v3072_v18 = vadd.f32 %v3071_v60, %v3070_v59 }
 0x1f8   : > { %v3073_v62 = vsel %vm217_vm1, %v3033_v61, 0.0  ;;  %v3837_v30 = vpop.f32.mrb[12].mxu0 }
 0x1f9   : > { %v2973_v37 = vadd.f32 %v2972_v15, %v2971_v14  ;;  %v3869_v47 = vadd.f32 %v3837_v30, %v4760_v2  ;;  %v2810_v54 = vpop.f32.mrb[13].mxu0  ;;  %v3074_v56 = vadd.f32 %v3073_v62, %v3072_v18 }
 0x1fa   : > { %v3870_v57 = vadd.f32 %v2810_v54, %v4762_v5  ;;  %v3838_v58 = vpop.f32.mrb[14].mxu0  ;;  %v3077_v5 = vsel %vm217_vm1, %v3035_v31, 0.0 }
 0x1fb   : > { %2935 = vst.msk [vmem:[%s4771_s20 + $0x70] sm:$0xff] %vm217_vm1, %v3869_v47  ;;  %v2975_v9 = vadd.f32 %v2974_v55, %v2973_v37  ;;  %v3871_v10 = vadd.f32 %v3838_v58, %v4764_v16  ;;  %v2813_v11 = vpop.f32.mrb[15].mxu0  ;;  %v3076_v12 = vadd.f32 %v3075_v6, %v3074_v56  ;;  %v3038_v26 = vmul.f32 %v3869_v47, %v3869_v47 }
 0x1fc   : > { %2933 = vst.msk [vmem:[%s4771_s20 + $0x60] sm:$0xff] %vm217_vm1, %v3870_v57  ;;  %v2976_v2 = vsel %vm217_vm1, %v3870_v57, 0.0  ;;  %v3036_v13 = vmul.f32 %v3870_v57, %v3870_v57  ;;  %v3872_v27 = vadd.f32 %v2813_v11, %v4766_v17  ;;  %v2980_v45 = vsel %vm217_vm1, %v3869_v47, 0.0 }
 0x1fd   : > { %v2977_v28 = vadd.f32 %v2976_v2, %v2975_v9  ;;  %2936 = vst.msk [vmem:[%s4771_s20 + $0x78] sm:$0xff] %vm217_vm1, %v3871_v10  ;;  %v3078_v29 = vadd.f32 %v3077_v5, %v3076_v12  ;;  %v3039_v40 = vmul.f32 %v3871_v10, %v3871_v10  ;;  %v2982_v0 = vsel %vm217_vm1, %v3871_v10, 0.0 }
 0x1fe   : > { %v3079_v44 = vsel %vm217_vm1, %v3036_v13, 0.0  ;;  %2934 = vst.msk [vmem:[%s4771_s20 + $0x68] sm:$0xff] %vm217_vm1, %v3872_v27  ;;  %v2978_v16 = vsel %vm217_vm1, %v3872_v27, 0.0  ;;  %v3037_v8 = vmul.f32 %v3872_v27, %v3872_v27  ;;  %v3083_v22 = vsel %vm217_vm1, %v3038_v26, 0.0 }
 0x1ff   : > { %v2979_v32 = vadd.f32 %v2978_v16, %v2977_v28  ;;  %v3705_v1 = vpop.f32.mrb[16].mxu1  ;;  %v3080_v17 = vadd.f32 %v3079_v44, %v3078_v29  ;;  %v3085_v38 = vsel %vm217_vm1, %v3039_v40, 0.0 }
 0x200   : > { %v3081_v46 = vsel %vm217_vm1, %v3037_v8, 0.0  ;;  %v1649_v24 = vpop.f32.mrb[17].mxu1  ;;  %v3841_v3 = vpop.f32.mrb[16].mxu0 }
 0x201   : > { %v2981_v42 = vadd.f32 %v2980_v45, %v2979_v32  ;;  %v3873_v49 = vadd.f32 %v3841_v3, %v3705_v1  ;;  %v3706_v50 = vpop.f32.mrb[18].mxu1  ;;  %v2826_v63 = vpop.f32.mrb[17].mxu0  ;;  %v3082_v7 = vadd.f32 %v3081_v46, %v3080_v17 }
 0x202   : > { %v3874_v19 = vadd.f32 %v2826_v63, %v1649_v24  ;;  %v1652_v20 = vpop.f32.mrb[19].mxu1  ;;  %v3842_v21 = vpop.f32.mrb[18].mxu0 }
 0x203   : > { %2939 = vst.msk [vmem:[%s4771_s20 + $0x90] sm:$0xff] %vm217_vm1, %v3873_v49  ;;  %v2983_v33 = vadd.f32 %v2982_v0, %v2981_v42  ;;  %v3875_v34 = vadd.f32 %v3842_v21, %v3706_v50  ;;  %v2829_v35 = vpop.f32.mrb[19].mxu0  ;;  %v3084_v36 = vadd.f32 %v3083_v22, %v3082_v7  ;;  %v3042_v59 = vmul.f32 %v3873_v49, %v3873_v49 }
 0x204   : > { %2937 = vst.msk [vmem:[%s4771_s20 + $0x80] sm:$0xff] %vm217_vm1, %v3874_v19  ;;  %v2984_v48 = vsel %vm217_vm1, %v3874_v19, 0.0  ;;  %v3040_v23 = vmul.f32 %v3874_v19, %v3874_v19  ;;  %v3876_v25 = vadd.f32 %v2829_v35, %v1652_v20  ;;  %v2988_v61 = vsel %vm217_vm1, %v3873_v49, 0.0 }
 0x205   : > { %v2985_v51 = vadd.f32 %v2984_v48, %v2983_v33  ;;  %2940 = vst.msk [vmem:[%s4771_s20 + $0x98] sm:$0xff] %vm217_vm1, %v3875_v34  ;;  %v3086_v39 = vadd.f32 %v3085_v38, %v3084_v36  ;;  %v3043_v62 = vmul.f32 %v3875_v34, %v3875_v34  ;;  %v2990_v54 = vsel %vm217_vm1, %v3875_v34, 0.0 }
 0x206   : > { %v3087_v41 = vsel %vm217_vm1, %v3040_v23, 0.0  ;;  %2938 = vst.msk [vmem:[%s4771_s20 + $0x88] sm:$0xff] %vm217_vm1, %v3876_v25  ;;  %v2986_v52 = vsel %vm217_vm1, %v3876_v25, 0.0  ;;  %v3041_v43 = vmul.f32 %v3876_v25, %v3876_v25  ;;  %v3091_v6 = vsel %vm217_vm1, %v3042_v59, 0.0 }
 0x207   : > { %v2987_v60 = vadd.f32 %v2986_v52, %v2985_v51  ;;  %v3709_v53 = vpop.f32.mrb[20].mxu1  ;;  %v3088_v4 = vadd.f32 %v3087_v41, %v3086_v39  ;;  %v3093_v5 = vsel %vm217_vm1, %v3043_v62, 0.0 }
 0x208   : > { %v3089_v14 = vsel %vm217_vm1, %v3041_v43, 0.0  ;;  %v1665_v15 = vpop.f32.mrb[21].mxu1  ;;  %v3845_v18 = vpop.f32.mrb[20].mxu0 }
 0x209   : > { %v2989_v30 = vadd.f32 %v2988_v61, %v2987_v60  ;;  %v3877_v31 = vadd.f32 %v3845_v18, %v3709_v53  ;;  %v3710_v37 = vpop.f32.mrb[22].mxu1  ;;  %v2842_v47 = vpop.f32.mrb[21].mxu0  ;;  %v3090_v55 = vadd.f32 %v3089_v14, %v3088_v4 }
 0x20a   : > { %v3878_v56 = vadd.f32 %v2842_v47, %v1665_v15  ;;  %v1668_v57 = vpop.f32.mrb[23].mxu1  ;;  %v3846_v58 = vpop.f32.mrb[22].mxu0 }
 0x20b   : > { %2943 = vst.msk [vmem:[%s4771_s20 + $0xb0] sm:$0xff] %vm217_vm1, %v3877_v31  ;;  %v2991_v9 = vadd.f32 %v2990_v54, %v2989_v30  ;;  %v3879_v10 = vadd.f32 %v3846_v58, %v3710_v37  ;;  %v2845_v11 = vpop.f32.mrb[23].mxu0  ;;  %v3092_v12 = vadd.f32 %v3091_v6, %v3090_v55  ;;  %v3046_v26 = vmul.f32 %v3877_v31, %v3877_v31 }
 0x20c   : > { %2941 = vst.msk [vmem:[%s4771_s20 + $0xa0] sm:$0xff] %vm217_vm1, %v3878_v56  ;;  %v2992_v2 = vsel %vm217_vm1, %v3878_v56, 0.0  ;;  %v3044_v13 = vmul.f32 %v3878_v56, %v3878_v56  ;;  %v3880_v27 = vadd.f32 %v2845_v11, %v1668_v57  ;;  %v2996_v45 = vsel %vm217_vm1, %v3877_v31, 0.0 }
 0x20d   : > { %v2993_v28 = vadd.f32 %v2992_v2, %v2991_v9  ;;  %2944 = vst.msk [vmem:[%s4771_s20 + $0xb8] sm:$0xff] %vm217_vm1, %v3879_v10  ;;  %v3094_v29 = vadd.f32 %v3093_v5, %v3092_v12  ;;  %v3047_v40 = vmul.f32 %v3879_v10, %v3879_v10  ;;  %v2998_v0 = vsel %vm217_vm1, %v3879_v10, 0.0 }
 0x20e   : > { %v3095_v44 = vsel %vm217_vm1, %v3044_v13, 0.0  ;;  %2942 = vst.msk [vmem:[%s4771_s20 + $0xa8] sm:$0xff] %vm217_vm1, %v3880_v27  ;;  %v2994_v16 = vsel %vm217_vm1, %v3880_v27, 0.0  ;;  %v3045_v8 = vmul.f32 %v3880_v27, %v3880_v27  ;;  %v3099_v22 = vsel %vm217_vm1, %v3046_v26, 0.0 }
 0x20f   : > { %v2995_v32 = vadd.f32 %v2994_v16, %v2993_v28  ;;  %v3713_v1 = vpop.f32.mrb[24].mxu1  ;;  %v3096_v17 = vadd.f32 %v3095_v44, %v3094_v29  ;;  %v3101_v38 = vsel %vm217_vm1, %v3047_v40, 0.0 }
 0x210   : > { %v3097_v46 = vsel %vm217_vm1, %v3045_v8, 0.0  ;;  %v1681_v24 = vpop.f32.mrb[25].mxu1  ;;  %v3849_v3 = vpop.f32.mrb[24].mxu0 }
 0x211   : > { %v2997_v42 = vadd.f32 %v2996_v45, %v2995_v32  ;;  %v3881_v49 = vadd.f32 %v3849_v3, %v3713_v1  ;;  %v3714_v50 = vpop.f32.mrb[26].mxu1  ;;  %v2858_v63 = vpop.f32.mrb[25].mxu0  ;;  %v3098_v7 = vadd.f32 %v3097_v46, %v3096_v17 }
 0x212   : > { %v3882_v19 = vadd.f32 %v2858_v63, %v1681_v24  ;;  %v1684_v20 = vpop.f32.mrb[27].mxu1  ;;  %v3850_v21 = vpop.f32.mrb[26].mxu0 }
 0x213   : > { %2947 = vst.msk [vmem:[%s4771_s20 + $0xd0] sm:$0xff] %vm217_vm1, %v3881_v49  ;;  %v2999_v33 = vadd.f32 %v2998_v0, %v2997_v42  ;;  %v3883_v34 = vadd.f32 %v3850_v21, %v3714_v50  ;;  %v2861_v35 = vpop.f32.mrb[27].mxu0  ;;  %v3100_v36 = vadd.f32 %v3099_v22, %v3098_v7  ;;  %v3050_v59 = vmul.f32 %v3881_v49, %v3881_v49 }
 0x214   : > { %2945 = vst.msk [vmem:[%s4771_s20 + $0xc0] sm:$0xff] %vm217_vm1, %v3882_v19  ;;  %v3000_v48 = vsel %vm217_vm1, %v3882_v19, 0.0  ;;  %v3048_v23 = vmul.f32 %v3882_v19, %v3882_v19  ;;  %v3884_v25 = vadd.f32 %v2861_v35, %v1684_v20  ;;  %v3004_v61 = vsel %vm217_vm1, %v3881_v49, 0.0 }
 0x215   : > { %v3001_v51 = vadd.f32 %v3000_v48, %v2999_v33  ;;  %2948 = vst.msk [vmem:[%s4771_s20 + $0xd8] sm:$0xff] %vm217_vm1, %v3883_v34  ;;  %v3102_v39 = vadd.f32 %v3101_v38, %v3100_v36  ;;  %v3051_v62 = vmul.f32 %v3883_v34, %v3883_v34  ;;  %v3006_v54 = vsel %vm217_vm1, %v3883_v34, 0.0 }
 0x216   : > { %v3103_v41 = vsel %vm217_vm1, %v3048_v23, 0.0  ;;  %2946 = vst.msk [vmem:[%s4771_s20 + $0xc8] sm:$0xff] %vm217_vm1, %v3884_v25  ;;  %v3002_v52 = vsel %vm217_vm1, %v3884_v25, 0.0  ;;  %v3049_v43 = vmul.f32 %v3884_v25, %v3884_v25  ;;  %v3107_v6 = vsel %vm217_vm1, %v3050_v59, 0.0 }
 0x217   : > { %v3003_v60 = vadd.f32 %v3002_v52, %v3001_v51  ;;  %v3717_v53 = vpop.f32.mrb[28].mxu1  ;;  %v3104_v4 = vadd.f32 %v3103_v41, %v3102_v39  ;;  %v3109_v5 = vsel %vm217_vm1, %v3051_v62, 0.0 }
 0x218   : > { %v3105_v14 = vsel %vm217_vm1, %v3049_v43, 0.0  ;;  %v1697_v15 = vpop.f32.mrb[29].mxu1  ;;  %v3853_v18 = vpop.f32.mrb[28].mxu0 }
 0x219   : > { %v3005_v30 = vadd.f32 %v3004_v61, %v3003_v60  ;;  %v3885_v31 = vadd.f32 %v3853_v18, %v3717_v53  ;;  %v3718_v37 = vpop.f32.mrb[30].mxu1  ;;  %v2874_v47 = vpop.f32.mrb[29].mxu0  ;;  %v3106_v55 = vadd.f32 %v3105_v14, %v3104_v4 }
 0x21a   : > { %v3886_v56 = vadd.f32 %v2874_v47, %v1697_v15  ;;  %v1700_v57 = vpop.f32.mrb[31].mxu1  ;;  %v3854_v58 = vpop.f32.mrb[30].mxu0 }
 0x21b   : > { %2951 = vst.msk [vmem:[%s4771_s20 + $0xf0] sm:$0xff] %vm217_vm1, %v3885_v31  ;;  %v3007_v9 = vadd.f32 %v3006_v54, %v3005_v30  ;;  %v3887_v10 = vadd.f32 %v3854_v58, %v3718_v37  ;;  %v2877_v11 = vpop.f32.mrb[31].mxu0  ;;  %v3108_v12 = vadd.f32 %v3107_v6, %v3106_v55  ;;  %v3054_v26 = vmul.f32 %v3885_v31, %v3885_v31 }
 0x21c   : > { %2949 = vst.msk [vmem:[%s4771_s20 + $0xe0] sm:$0xff] %vm217_vm1, %v3886_v56  ;;  %v3008_v2 = vsel %vm217_vm1, %v3886_v56, 0.0  ;;  %v3052_v13 = vmul.f32 %v3886_v56, %v3886_v56  ;;  %v3888_v27 = vadd.f32 %v2877_v11, %v1700_v57  ;;  %v3012_v1 = vsel %vm217_vm1, %v3885_v31, 0.0 }
 0x21d   : > { %v3009_v28 = vadd.f32 %v3008_v2, %v3007_v9  ;;  %2952 = vst.msk [vmem:[%s4771_s20 + $0xf8] sm:$0xff] %vm217_vm1, %v3887_v10  ;;  %v3110_v29 = vadd.f32 %v3109_v5, %v3108_v12  ;;  %v3055_v46 = vmul.f32 %v3887_v10, %v3887_v10  ;;  %v3014_v3 = vsel %vm217_vm1, %v3887_v10, 0.0 }
 0x21e   : > { %v3111_v44 = vsel %vm217_vm1, %v3052_v13, 0.0  ;;  %2950 = vst.msk [vmem:[%s4771_s20 + $0xe8] sm:$0xff] %vm217_vm1, %v3888_v27  ;;  %v3010_v16 = vsel %vm217_vm1, %v3888_v27, 0.0  ;;  %v3053_v8 = vmul.f32 %v3888_v27, %v3888_v27  ;;  %v3115_v42 = vsel %vm217_vm1, %v3054_v26, 0.0 }
 0x21f   : > { %v3011_v32 = vadd.f32 %v3010_v16, %v3009_v28  ;;  %v3112_v45 = vadd.f32 %v3111_v44, %v3110_v29  ;;  %v3117_v63 = vsel %vm217_vm1, %v3055_v46, 0.0 }
 0x220   : > { %v3113_v17 = vsel %vm217_vm1, %v3053_v8, 0.0 }
 0x221   : > { %v3013_v24 = vadd.f32 %v3012_v1, %v3011_v32  ;;  %v3114_v40 = vadd.f32 %v3113_v17, %v3112_v45 }
 0x223   : > { %v3015_v49 = vadd.f32 %v3014_v3, %v3013_v24  ;;  %v3116_v50 = vadd.f32 %v3115_v42, %v3114_v40 }
 0x225   : > { %v3016_v0 = vrot.slane %v3015_v49, 4  ;;  %v3118_v7 = vadd.f32 %v3117_v63, %v3116_v50 }
 0x227   : > { %v3017_v19 = vadd.f32 %v3016_v0, %v3015_v49  ;;  %v3119_v20 = vrot.slane %v3118_v7, 4 }
 0x229   : > { %v3018_v21 = vrot.slane %v3017_v19, 2  ;;  %v3120_v22 = vadd.f32 %v3119_v20, %v3118_v7 }
 0x22b   : > { %v3019_v33 = vadd.f32 %v3018_v21, %v3017_v19  ;;  %v3121_v34 = vrot.slane %v3120_v22, 2 }
 0x22d   : > { %v3020_v35 = vrot.slane %v3019_v33, 1  ;;  %v3122_v36 = vadd.f32 %v3121_v34, %v3120_v22 }
 0x22f   : > { %v3021_v48 = vadd.f32 %v3020_v35, %v3019_v33  ;;  %v3123_v23 = vrot.slane %v3122_v36, 1 }
 0x231   : > { %3023 = vst.msk [vmem:[%s212_s22] sm:$0x1] %vm3022_vm3, %v3021_v48  ;;  %v3124_v25 = vadd.f32 %v3123_v23, %v3122_v36 }
 0x233   : > { %3125 = vst.msk [vmem:[%s215_s26] sm:$0x1] %vm3022_vm3, %v3124_v25 }
 0x234 PF: > { %s15_s15 = sadd.s32 1, %s4138_s15  }
 0x235   : > { %p12_p5 = scmp.ge.s32.totalorder %s15_s15, 4  }
 0x237   :  { %14 = sbr.rel (!%p12_p5) target bundleno = 1 (0x1), region = 92 }

</bundles_post_ra>
